<compile_context>
chip_gen: v5e
topology: v5e:2x2
jax: 0.10.0
libtpu: 0.0.40
codegen_flags: <defaults>
</compile_context>

<pallas_src>
import functools

import jax
import jax.numpy as jnp
from jax.experimental import pallas as pl
from jax.experimental.pallas import tpu as pltpu


# ---------------------------------------------------------------------------
# Fused DoubleConv kernel:
#   conv3x3(pad=1) -> BN(folded) -> ReLU -> conv3x3(pad=1) -> BN(folded) -> ReLU
# over the virtual channel concat [x2, x1].  Grid = (batch, row_tile).
# Inputs are spatially pre-padded with 2 zero rows / 1 zero col per side.
# ---------------------------------------------------------------------------
def _double_conv_kernel(x2_ref, x1_ref, w1_ref, b1_ref, w2_ref, b2_ref, o_ref,
                        *, H, W, TH):
    r = pl.program_id(1)
    r0 = pl.multiple_of(r * TH, TH)      # first padded input row of this tile
    hrows = TH + 2                       # conv1 output rows incl. conv2 halo

    # (TH+4, W+2, C) input slabs for this row tile.
    x2t = x2_ref[0, pl.ds(r0, TH + 4), :, :]
    x1t = x1_ref[0, pl.ds(r0, TH + 4), :, :]

    # ---- conv1: one deep-K dot on an in-VMEM im2col patch ------------------
    # Channel order per (kh, kw) tap block is [x2 channels, x1 channels],
    # matching torch.cat([x2, x1], dim=1) and the weight layout below.
    taps = []
    for kh in range(3):
        for kw in range(3):
            taps.append(x2t[kh:kh + hrows, kw:kw + W, :])
            taps.append(x1t[kh:kh + hrows, kw:kw + W, :])
    patch1 = jnp.concatenate(taps, axis=-1).reshape(hrows * W, -1)
    h = jnp.dot(patch1, w1_ref[...], preferred_element_type=jnp.float32)
    h = jnp.maximum(h + b1_ref[...], 0.0)

    cmid = h.shape[-1]
    h = h.reshape(hrows, W, cmid)
    # Halo rows that fall outside the image are conv2's zero padding.
    row = jax.lax.broadcasted_iota(jnp.int32, (hrows, 1), 0) + (r * TH - 1)
    inside = jnp.logical_and(row >= 0, row < H)
    h = jnp.where(inside[:, :, None], h, 0.0).astype(jnp.bfloat16)

    # ---- conv2: pad columns in VMEM, one deep-K dot -------------------------
    zcol = jnp.zeros((hrows, 1, cmid), jnp.bfloat16)
    hp = jnp.concatenate([zcol, h, zcol], axis=1)        # (hrows, W+2, cmid)
    taps2 = [hp[kh:kh + TH, kw:kw + W, :]
             for kh in range(3) for kw in range(3)]
    patch2 = jnp.concatenate(taps2, axis=-1).reshape(TH * W, -1)
    y = jnp.dot(patch2, w2_ref[...], preferred_element_type=jnp.float32)
    y = jnp.maximum(y + b2_ref[...], 0.0)
    o_ref[0] = y.astype(o_ref.dtype)


# ---------------------------------------------------------------------------
# Helpers
# ---------------------------------------------------------------------------
def _round_up(v, m):
    return -(-v // m) * m


def _prep_weight_im2col(w_oihw, scale, cout_pad):
    """(Cout, Cin, 3, 3) -> (9*Cin, Cout_pad) bf16 with the BN scale folded in.

    Row order is (kh, kw, cin), matching the in-kernel im2col concat order.
    """
    cout, cin = w_oihw.shape[0], w_oihw.shape[1]
    w = jnp.transpose(w_oihw, (2, 3, 1, 0)).reshape(9 * cin, cout)
    w = w * scale.reshape(1, cout).astype(jnp.float32)
    if cout_pad != cout:
        w = jnp.pad(w, ((0, 0), (0, cout_pad - cout)))
    return w.astype(jnp.bfloat16)


def _pick_row_tile(H, W, cin_tot, cmid, cout_pad, vmem_budget=8 << 20):
    """Largest row tile TH dividing H whose fused working set fits the budget,
    preferring >= 2 row tiles (v7x megacore + pipelining)."""
    def tile_bytes(t):
        r1, r2 = (t + 2) * W, t * W
        return (r1 * 9 * cin_tot * 2     # conv1 im2col patch (bf16)
                + r1 * cmid * 6          # h (f32 + bf16)
                + r2 * 9 * cmid * 2      # conv2 im2col patch (bf16)
                + r2 * cout_pad * 6)     # conv2 acc (f32) + out tile (bf16)

    divisors = [t for t in range(H, 0, -1)
                if H % t == 0 and ((t * W) % 8 == 0 or t == H)]
    for t in divisors:                   # prefer real tiling (>= 2 row tiles)
        if t < H and tile_bytes(t) <= vmem_budget:
            return t
    for t in divisors:                   # otherwise anything that fits
        if tile_bytes(t) <= vmem_budget:
            return t
    return divisors[-1]


def bn_fold(bn, conv_bias, eps=1e-5):
    gamma, beta, mean, var = bn
    scale = gamma * jax.lax.rsqrt(var + eps)
    shift = (conv_bias - mean) * scale + beta
    return scale, shift


def _interp_matrix(n_in, n_out):
    if n_in == 1:
        return jnp.ones((n_out, 1), jnp.float32)
    s = jnp.arange(n_out, dtype=jnp.float32) * ((n_in - 1) / (n_out - 1))
    i0 = jnp.floor(s).astype(jnp.int32)
    i1 = jnp.minimum(i0 + 1, n_in - 1)
    f = s - i0.astype(jnp.float32)
    return (jax.nn.one_hot(i0, n_in, dtype=jnp.float32) * (1.0 - f)[:, None]
            + jax.nn.one_hot(i1, n_in, dtype=jnp.float32) * f[:, None])


def upsample_bilinear_x2(x, precision=None):
    """nn.Upsample(scale_factor=2, mode='bilinear', align_corners=True), NHWC.
    Gather-free: two small matmuls against static interpolation matrices."""
    _, H, W, _ = x.shape
    Ah = _interp_matrix(H, 2 * H).astype(x.dtype)
    Aw = _interp_matrix(W, 2 * W).astype(x.dtype)
    y = jnp.einsum('oh,nhwc->nowc', Ah, x, precision=precision)
    y = jnp.einsum('pw,nowc->nopc', Aw, y, precision=precision)
    return y


# ---------------------------------------------------------------------------
# Up.forward(x1, x2) — NHWC activations, returns NHWC f32.
# ---------------------------------------------------------------------------
def up_forward(x1, x2, P):
    N, H, W, c2 = x2.shape

    # Bilinear x2 upsample of x1 in bf16 (halves the HBM intermediate).
    x1u = upsample_bilinear_x2(x1.astype(jnp.bfloat16))
    dY = H - x1u.shape[1]
    dX = W - x1u.shape[2]

    # F.pad(diff) fused with the conv halo pre-pad: rows need 2 zero rows per
    # side (conv1 pad + conv2 halo), cols need 1 (conv2's col pad is added in
    # VMEM inside the kernel).
    x1p = jnp.pad(x1u, ((0, 0),
                        (2 + dY // 2, 2 + dY - dY // 2),
                        (1 + dX // 2, 1 + dX - dX // 2), (0, 0)))
    x2p = jnp.pad(x2.astype(jnp.bfloat16), ((0, 0), (2, 2), (1, 1), (0, 0)))
    c1 = x1p.shape[-1]

    cmid = P['w1'].shape[0]
    cout = P['w2'].shape[0]
    cout_pad = _round_up(max(cout, 128), 128)   # lane-dense output stores

    s1, b1 = bn_fold(P['bn1'], P['b1'])
    s2, b2 = bn_fold(P['bn2'], P['b2'])
    w1 = _prep_weight_im2col(P['w1'], s1, cmid)       # (9*(c2+c1), cmid) bf16
    w2 = _prep_weight_im2col(P['w2'], s2, cout_pad)   # (9*cmid, cout_pad) bf16
    b1 = b1.reshape(1, cmid).astype(jnp.float32)
    b2 = jnp.pad(b2.astype(jnp.float32),
                 (0, cout_pad - cout)).reshape(1, cout_pad)

    TH = _pick_row_tile(H, W, c2 + c1, cmid, cout_pad)
    n_r = H // TH

    out = pl.pallas_call(
        functools.partial(_double_conv_kernel, H=H, W=W, TH=TH),
        out_shape=jax.ShapeDtypeStruct((N, H * W, cout_pad), jnp.bfloat16),
        grid=(N, n_r),
        in_specs=[
            pl.BlockSpec((1, H + 4, W + 2, c2), lambda n, r: (n, 0, 0, 0)),
            pl.BlockSpec((1, H + 4, W + 2, c1), lambda n, r: (n, 0, 0, 0)),
            pl.BlockSpec(w1.shape, lambda n, r: (0, 0)),
            pl.BlockSpec(b1.shape, lambda n, r: (0, 0)),
            pl.BlockSpec(w2.shape, lambda n, r: (0, 0)),
            pl.BlockSpec(b2.shape, lambda n, r: (0, 0)),
        ],
        out_specs=pl.BlockSpec((1, TH * W, cout_pad), lambda n, r: (n, r, 0)),
        compiler_params=pltpu.CompilerParams(
            dimension_semantics=("parallel", "parallel"),
            vmem_limit_bytes=48 * 1024 * 1024),
    )(x2p, x1p, w1, b1, w2, b2)

    out = out.reshape(N, H, W, cout_pad)[..., :cout]
    return out.astype(jnp.float32)


# ---------------------------------------------------------------------------
# Pure-JAX f32 reference (HIGHEST precision) for the correctness cross-check.
# ---------------------------------------------------------------------------
def _reference_up(x1, x2, P):
    x1 = upsample_bilinear_x2(x1, precision=jax.lax.Precision.HIGHEST)
    dY = x2.shape[1] - x1.shape[1]
    dX = x2.shape[2] - x1.shape[2]
    if dY or dX:
        x1 = jnp.pad(x1, ((0, 0), (dY // 2, dY - dY // 2),
                          (dX // 2, dX - dX // 2), (0, 0)))
    x = jnp.concatenate([x2, x1], axis=-1)

    def conv_bn_relu(xin, w, b, bn):
        y = jax.lax.conv_general_dilated(
            xin, w, window_strides=(1, 1), padding=((1, 1), (1, 1)),
            dimension_numbers=('NHWC', 'OIHW', 'NHWC'),
            precision=jax.lax.Precision.HIGHEST) + b
        gamma, beta, mean, var = bn
        y = (y - mean) * gamma * jax.lax.rsqrt(var + 1e-5) + beta
        return jnp.maximum(y, 0.0)

    h = conv_bn_relu(x, P['w1'], P['b1'], P['bn1'])
    return conv_bn_relu(h, P['w2'], P['b2'], P['bn2'])


# ---------------------------------------------------------------------------
# Deterministic synthetic params for Up(in_channels, out_channels, bilinear=True)
# ---------------------------------------------------------------------------
def init_up_params(key, in_channels, out_channels, mid_channels):
    ks = iter(jax.random.split(key, 16))

    def conv_w(cout, cin):
        fan_in = cin * 9
        return jax.random.normal(next(ks), (cout, cin, 3, 3),
                                 jnp.float32) / (fan_in ** 0.5)

    def bias(c):
        return 0.01 * jax.random.normal(next(ks), (c,), jnp.float32)

    def bn(c):
        gamma = 1.0 + 0.1 * jax.random.normal(next(ks), (c,), jnp.float32)
        beta = 0.01 * jax.random.normal(next(ks), (c,), jnp.float32)
        mean = 0.01 * jax.random.normal(next(ks), (c,), jnp.float32)
        var = 0.5 + jax.random.uniform(next(ks), (c,), jnp.float32)
        return (gamma, beta, mean, var)

    return {
        'w1': conv_w(mid_channels, in_channels), 'b1': bias(mid_channels),
        'bn1': bn(mid_channels),
        'w2': conv_w(out_channels, mid_channels), 'b2': bias(out_channels),
        'bn2': bn(out_channels),
    }


# ---------------------------------------------------------------------------
if __name__ == "__main__":
    key = jax.random.PRNGKey(0)
    kp, k1, k2 = jax.random.split(key, 3)

    in_channels, out_channels = 64, 32          # Up(64, 32, bilinear=True)
    P = init_up_params(kp, in_channels, out_channels, in_channels // 2)

    # PyTorch-style NCHW inputs: x1 = deeper feature (half spatial), x2 = skip.
    # cat([x2, up(x1)], dim=1) has 32 + 32 = 64 = in_channels channels.
    x1_nchw = jax.random.normal(k1, (2, in_channels // 2, 8, 8), jnp.float32)
    x2_nchw = jax.random.normal(k2, (2, in_channels // 2, 16, 16), jnp.float32)

    x1 = jnp.transpose(x1_nchw, (0, 2, 3, 1))
    x2 = jnp.transpose(x2_nchw, (0, 2, 3, 1))

    y_nhwc = jax.jit(up_forward)(x1, x2, P)
    y_nchw = jnp.transpose(y_nhwc, (0, 3, 1, 2))
    jax.block_until_ready(y_nchw)

    assert y_nchw.shape == (2, out_channels, 16, 16), y_nchw.shape
    assert bool(jnp.all(jnp.isfinite(y_nchw)))

    # Cross-check vs a full-f32 XLA reference (loose tolerance: kernel path is
    # bf16 operands with f32 MXU accumulation).
    y_ref = jnp.transpose(jax.jit(_reference_up)(x1, x2, P), (0, 3, 1, 2))
    err = float(jnp.max(jnp.abs(y_nchw - y_ref)))
    ref_scale = float(jnp.max(jnp.abs(y_ref)))
    assert err <= 0.08 * ref_scale + 0.08, (err, ref_scale)

    print("KERNEL_OK")
</pallas_src>

<mosaic_0001>
module attributes {stable_mosaic.version = 11 : i64} {
  func.func @_double_conv_kernel(%arg0: i32, %arg1: i32, %arg2: memref<1x20x18x32xbf16, #tpu.memory_space<vmem>>, %arg3: memref<1x20x18x32xbf16, #tpu.memory_space<vmem>>, %arg4: memref<576x32xbf16, #tpu.memory_space<vmem>>, %arg5: memref<1x32xf32, #tpu.memory_space<vmem>>, %arg6: memref<288x128xbf16, #tpu.memory_space<vmem>>, %arg7: memref<1x128xf32, #tpu.memory_space<vmem>>, %arg8: memref<1x128x128xbf16, #tpu.memory_space<vmem>>) attributes {dimension_semantics = [#tpu.dimension_semantics<parallel>, #tpu.dimension_semantics<parallel>], iteration_bounds = array<i64: 2, 2>, scalar_prefetch = 0 : i64, scratch_operands = 0 : i64, tpu.core_type = #tpu.core_type<tc>, window_params = [{transform_indices = @transform_0, window_bounds = array<i64: 1, 20, 18, 32>}, {transform_indices = @transform_1, window_bounds = array<i64: 1, 20, 18, 32>}, {pipeline_mode = #tpu.pipeline_mode<synchronous>, transform_indices = @transform_2, window_bounds = array<i64: 576, 32>}, {pipeline_mode = #tpu.pipeline_mode<synchronous>, transform_indices = @transform_3, window_bounds = array<i64: 1, 32>}, {pipeline_mode = #tpu.pipeline_mode<synchronous>, transform_indices = @transform_4, window_bounds = array<i64: 288, 128>}, {pipeline_mode = #tpu.pipeline_mode<synchronous>, transform_indices = @transform_5, window_bounds = array<i64: 1, 128>}, {transform_indices = @transform_6, window_bounds = array<i64: 1, 128, 128>}]} {
    %c8_i32 = arith.constant 8 : i32
    %0 = arith.muli %arg1, %c8_i32 : i32
    %1 = tpu.assume_multiple %0, 8 : i32
    %c0 = arith.constant 0 : index
    %2 = arith.index_cast %1 : i32 to index
    %c0_0 = arith.constant 0 : index
    %c0_1 = arith.constant 0 : index
    %3 = vector.load %arg2[%c0, %2, %c0_0, %c0_1] : memref<1x20x18x32xbf16, #tpu.memory_space<vmem>>, vector<1x12x18x32xbf16>
    %4 = vector.shape_cast %3 : vector<1x12x18x32xbf16> to vector<12x18x32xbf16>
    %c0_2 = arith.constant 0 : index
    %5 = arith.index_cast %1 : i32 to index
    %c0_3 = arith.constant 0 : index
    %c0_4 = arith.constant 0 : index
    %6 = vector.load %arg3[%c0_2, %5, %c0_3, %c0_4] : memref<1x20x18x32xbf16, #tpu.memory_space<vmem>>, vector<1x12x18x32xbf16>
    %7 = vector.shape_cast %6 : vector<1x12x18x32xbf16> to vector<12x18x32xbf16>
    %8 = vector.extract_strided_slice %4 {offsets = [0, 0, 0], sizes = [10, 16, 32], strides = [1, 1, 1]} : vector<12x18x32xbf16> to vector<10x16x32xbf16>
    %9 = vector.extract_strided_slice %7 {offsets = [0, 0, 0], sizes = [10, 16, 32], strides = [1, 1, 1]} : vector<12x18x32xbf16> to vector<10x16x32xbf16>
    %10 = vector.extract_strided_slice %4 {offsets = [0, 1, 0], sizes = [10, 16, 32], strides = [1, 1, 1]} : vector<12x18x32xbf16> to vector<10x16x32xbf16>
    %11 = vector.extract_strided_slice %7 {offsets = [0, 1, 0], sizes = [10, 16, 32], strides = [1, 1, 1]} : vector<12x18x32xbf16> to vector<10x16x32xbf16>
    %12 = vector.extract_strided_slice %4 {offsets = [0, 2, 0], sizes = [10, 16, 32], strides = [1, 1, 1]} : vector<12x18x32xbf16> to vector<10x16x32xbf16>
    %13 = vector.extract_strided_slice %7 {offsets = [0, 2, 0], sizes = [10, 16, 32], strides = [1, 1, 1]} : vector<12x18x32xbf16> to vector<10x16x32xbf16>
    %14 = vector.extract_strided_slice %4 {offsets = [1, 0, 0], sizes = [10, 16, 32], strides = [1, 1, 1]} : vector<12x18x32xbf16> to vector<10x16x32xbf16>
    %15 = vector.extract_strided_slice %7 {offsets = [1, 0, 0], sizes = [10, 16, 32], strides = [1, 1, 1]} : vector<12x18x32xbf16> to vector<10x16x32xbf16>
    %16 = vector.extract_strided_slice %4 {offsets = [1, 1, 0], sizes = [10, 16, 32], strides = [1, 1, 1]} : vector<12x18x32xbf16> to vector<10x16x32xbf16>
    %17 = vector.extract_strided_slice %7 {offsets = [1, 1, 0], sizes = [10, 16, 32], strides = [1, 1, 1]} : vector<12x18x32xbf16> to vector<10x16x32xbf16>
    %18 = vector.extract_strided_slice %4 {offsets = [1, 2, 0], sizes = [10, 16, 32], strides = [1, 1, 1]} : vector<12x18x32xbf16> to vector<10x16x32xbf16>
    %19 = vector.extract_strided_slice %7 {offsets = [1, 2, 0], sizes = [10, 16, 32], strides = [1, 1, 1]} : vector<12x18x32xbf16> to vector<10x16x32xbf16>
    %20 = vector.extract_strided_slice %4 {offsets = [2, 0, 0], sizes = [10, 16, 32], strides = [1, 1, 1]} : vector<12x18x32xbf16> to vector<10x16x32xbf16>
    %21 = vector.extract_strided_slice %7 {offsets = [2, 0, 0], sizes = [10, 16, 32], strides = [1, 1, 1]} : vector<12x18x32xbf16> to vector<10x16x32xbf16>
    %22 = vector.extract_strided_slice %4 {offsets = [2, 1, 0], sizes = [10, 16, 32], strides = [1, 1, 1]} : vector<12x18x32xbf16> to vector<10x16x32xbf16>
    %23 = vector.extract_strided_slice %7 {offsets = [2, 1, 0], sizes = [10, 16, 32], strides = [1, 1, 1]} : vector<12x18x32xbf16> to vector<10x16x32xbf16>
    %24 = vector.extract_strided_slice %4 {offsets = [2, 2, 0], sizes = [10, 16, 32], strides = [1, 1, 1]} : vector<12x18x32xbf16> to vector<10x16x32xbf16>
    %25 = vector.extract_strided_slice %7 {offsets = [2, 2, 0], sizes = [10, 16, 32], strides = [1, 1, 1]} : vector<12x18x32xbf16> to vector<10x16x32xbf16>
    %26 = tpu.concatenate %8, %9, %10, %11, %12, %13, %14, %15, %16, %17, %18, %19, %20, %21, %22, %23 in 2 : vector<10x16x32xbf16>, vector<10x16x32xbf16>, vector<10x16x32xbf16>, vector<10x16x32xbf16>, vector<10x16x32xbf16>, vector<10x16x32xbf16>, vector<10x16x32xbf16>, vector<10x16x32xbf16>, vector<10x16x32xbf16>, vector<10x16x32xbf16>, vector<10x16x32xbf16>, vector<10x16x32xbf16>, vector<10x16x32xbf16>, vector<10x16x32xbf16>, vector<10x16x32xbf16>, vector<10x16x32xbf16> -> vector<10x16x512xbf16>
    %27 = tpu.concatenate %24, %25 in 2 : vector<10x16x32xbf16>, vector<10x16x32xbf16> -> vector<10x16x64xbf16>
    %28 = tpu.concatenate %26, %27 in 2 : vector<10x16x512xbf16>, vector<10x16x64xbf16> -> vector<10x16x576xbf16>
    %29 = vector.shape_cast %28 : vector<10x16x576xbf16> to vector<160x576xbf16>
    %c0_5 = arith.constant 0 : index
    %c0_6 = arith.constant 0 : index
    %30 = vector.load %arg4[%c0_5, %c0_6] : memref<576x32xbf16, #tpu.memory_space<vmem>>, vector<576x32xbf16>
    %cst = arith.constant dense<0.000000e+00> : vector<160x32xf32>
    %31 = tpu.matmul %29, %30, %cst {dimension_numbers = #tpu.dot_dimension_numbers<[1], [0], [0], [1], [0, 0, 1, 1], [], []>} : vector<160x576xbf16>, vector<576x32xbf16>, vector<160x32xf32> -> vector<160x32xf32>
    %c0_7 = arith.constant 0 : index
    %c0_8 = arith.constant 0 : index
    %32 = vector.load %arg5[%c0_7, %c0_8] : memref<1x32xf32, #tpu.memory_space<vmem>>, vector<1x32xf32>
    %33 = vector.broadcast %32 : vector<1x32xf32> to vector<160x32xf32>
    %34 = arith.addf %31, %33 : vector<160x32xf32>
    %cst_9 = arith.constant 0.000000e+00 : f32
    %35 = vector.broadcast %cst_9 : f32 to vector<160x32xf32>
    %36 = arith.maximumf %34, %35 : vector<160x32xf32>
    %37 = vector.shape_cast %36 : vector<160x32xf32> to vector<10x16x32xf32>
    %38 = tpu.iota {dimensions = array<i32: 0>} : vector<10x1xi32>
    %c8_i32_10 = arith.constant 8 : i32
    %39 = arith.muli %arg1, %c8_i32_10 : i32
    %c1_i32 = arith.constant 1 : i32
    %40 = arith.subi %39, %c1_i32 : i32
    %41 = vector.broadcast %40 : i32 to vector<10x1xi32>
    %42 = arith.addi %38, %41 : vector<10x1xi32>
    %c0_i32 = arith.constant 0 : i32
    %43 = vector.broadcast %c0_i32 : i32 to vector<10x1xi32>
    %44 = arith.cmpi sge, %42, %43 : vector<10x1xi32>
    %c16_i32 = arith.constant 16 : i32
    %45 = vector.broadcast %c16_i32 : i32 to vector<10x1xi32>
    %46 = arith.cmpi slt, %42, %45 : vector<10x1xi32>
    %47 = arith.andi %44, %46 : vector<10x1xi1>
    %48 = vector.shape_cast %47 : vector<10x1xi1> to vector<10x1x1xi1>
    %cst_11 = arith.constant 0.000000e+00 : f32
    %49 = vector.shape_cast %48 : vector<10x1x1xi1> to vector<10x1x1xi1>
    %50 = vector.broadcast %49 : vector<10x1x1xi1> to vector<10x16x32xi1>
    %51 = vector.broadcast %cst_11 : f32 to vector<10x16x32xf32>
    %52 = arith.select %50, %37, %51 : vector<10x16x32xi1>, vector<10x16x32xf32>
    %53 = arith.truncf %52 : vector<10x16x32xf32> to vector<10x16x32xbf16>
    %cst_12 = arith.constant 0.000000e+00 : bf16
    %54 = vector.broadcast %cst_12 : bf16 to vector<10x1x32xbf16>
    %55 = tpu.concatenate %54, %53, %54 in 1 : vector<10x1x32xbf16>, vector<10x16x32xbf16>, vector<10x1x32xbf16> -> vector<10x18x32xbf16>
    %56 = vector.extract_strided_slice %55 {offsets = [0, 0, 0], sizes = [8, 16, 32], strides = [1, 1, 1]} : vector<10x18x32xbf16> to vector<8x16x32xbf16>
    %57 = vector.extract_strided_slice %55 {offsets = [0, 1, 0], sizes = [8, 16, 32], strides = [1, 1, 1]} : vector<10x18x32xbf16> to vector<8x16x32xbf16>
    %58 = vector.extract_strided_slice %55 {offsets = [0, 2, 0], sizes = [8, 16, 32], strides = [1, 1, 1]} : vector<10x18x32xbf16> to vector<8x16x32xbf16>
    %59 = vector.extract_strided_slice %55 {offsets = [1, 0, 0], sizes = [8, 16, 32], strides = [1, 1, 1]} : vector<10x18x32xbf16> to vector<8x16x32xbf16>
    %60 = vector.extract_strided_slice %55 {offsets = [1, 1, 0], sizes = [8, 16, 32], strides = [1, 1, 1]} : vector<10x18x32xbf16> to vector<8x16x32xbf16>
    %61 = vector.extract_strided_slice %55 {offsets = [1, 2, 0], sizes = [8, 16, 32], strides = [1, 1, 1]} : vector<10x18x32xbf16> to vector<8x16x32xbf16>
    %62 = vector.extract_strided_slice %55 {offsets = [2, 0, 0], sizes = [8, 16, 32], strides = [1, 1, 1]} : vector<10x18x32xbf16> to vector<8x16x32xbf16>
    %63 = vector.extract_strided_slice %55 {offsets = [2, 1, 0], sizes = [8, 16, 32], strides = [1, 1, 1]} : vector<10x18x32xbf16> to vector<8x16x32xbf16>
    %64 = vector.extract_strided_slice %55 {offsets = [2, 2, 0], sizes = [8, 16, 32], strides = [1, 1, 1]} : vector<10x18x32xbf16> to vector<8x16x32xbf16>
    %65 = tpu.concatenate %56, %57, %58, %59, %60, %61, %62, %63, %64 in 2 : vector<8x16x32xbf16>, vector<8x16x32xbf16>, vector<8x16x32xbf16>, vector<8x16x32xbf16>, vector<8x16x32xbf16>, vector<8x16x32xbf16>, vector<8x16x32xbf16>, vector<8x16x32xbf16>, vector<8x16x32xbf16> -> vector<8x16x288xbf16>
    %66 = vector.shape_cast %65 : vector<8x16x288xbf16> to vector<128x288xbf16>
    %c0_13 = arith.constant 0 : index
    %c0_14 = arith.constant 0 : index
    %67 = vector.load %arg6[%c0_13, %c0_14] : memref<288x128xbf16, #tpu.memory_space<vmem>>, vector<288x128xbf16>
    %cst_15 = arith.constant dense<0.000000e+00> : vector<128x128xf32>
    %68 = tpu.matmul %66, %67, %cst_15 {dimension_numbers = #tpu.dot_dimension_numbers<[1], [0], [0], [1], [0, 0, 1, 1], [], []>} : vector<128x288xbf16>, vector<288x128xbf16>, vector<128x128xf32> -> vector<128x128xf32>
    %c0_16 = arith.constant 0 : index
    %c0_17 = arith.constant 0 : index
    %69 = vector.load %arg7[%c0_16, %c0_17] : memref<1x128xf32, #tpu.memory_space<vmem>>, vector<1x128xf32>
    %70 = vector.broadcast %69 : vector<1x128xf32> to vector<128x128xf32>
    %71 = arith.addf %68, %70 : vector<128x128xf32>
    %cst_18 = arith.constant 0.000000e+00 : f32
    %72 = vector.broadcast %cst_18 : f32 to vector<128x128xf32>
    %73 = arith.maximumf %71, %72 : vector<128x128xf32>
    %74 = arith.truncf %73 : vector<128x128xf32> to vector<128x128xbf16>
    %c0_19 = arith.constant 0 : index
    %c0_20 = arith.constant 0 : index
    %c0_21 = arith.constant 0 : index
    %75 = vector.load %arg8[%c0_19, %c0_20, %c0_21] : memref<1x128x128xbf16, #tpu.memory_space<vmem>>, vector<1x128x128xbf16>
    %76 = vector.shape_cast %75 : vector<1x128x128xbf16> to vector<128x128xbf16>
    %77 = vector.shape_cast %74 : vector<128x128xbf16> to vector<1x128x128xbf16>
    tpu.vector_store %arg8[%c0_19, %c0_20, %c0_21], %77 {strides = array<i32>} : memref<1x128x128xbf16, #tpu.memory_space<vmem>>, vector<1x128x128xbf16>,
    return
  }
  func.func @transform_0(%arg0: i32, %arg1: i32) -> (i32, i32, i32, i32) {
    %c0_i32 = arith.constant 0 : i32
    %c0_i32_0 = arith.constant 0 : i32
    %c0_i32_1 = arith.constant 0 : i32
    %c0_i32_2 = arith.constant 0 : i32
    return %arg0, %c0_i32, %c0_i32_0, %c0_i32_1 : i32, i32, i32, i32
  }
  func.func @transform_1(%arg0: i32, %arg1: i32) -> (i32, i32, i32, i32) {
    %c0_i32 = arith.constant 0 : i32
    %c0_i32_0 = arith.constant 0 : i32
    %c0_i32_1 = arith.constant 0 : i32
    %c0_i32_2 = arith.constant 0 : i32
    return %arg0, %c0_i32, %c0_i32_0, %c0_i32_1 : i32, i32, i32, i32
  }
  func.func @transform_2(%arg0: i32, %arg1: i32) -> (i32, i32) {
    %c0_i32 = arith.constant 0 : i32
    %c0_i32_0 = arith.constant 0 : i32
    %c0_i32_1 = arith.constant 0 : i32
    return %c0_i32, %c0_i32_0 : i32, i32
  }
  func.func @transform_3(%arg0: i32, %arg1: i32) -> (i32, i32) {
    %c0_i32 = arith.constant 0 : i32
    %c0_i32_0 = arith.constant 0 : i32
    %c0_i32_1 = arith.constant 0 : i32
    return %c0_i32, %c0_i32_0 : i32, i32
  }
  func.func @transform_4(%arg0: i32, %arg1: i32) -> (i32, i32) {
    %c0_i32 = arith.constant 0 : i32
    %c0_i32_0 = arith.constant 0 : i32
    %c0_i32_1 = arith.constant 0 : i32
    return %c0_i32, %c0_i32_0 : i32, i32
  }
  func.func @transform_5(%arg0: i32, %arg1: i32) -> (i32, i32) {
    %c0_i32 = arith.constant 0 : i32
    %c0_i32_0 = arith.constant 0 : i32
    %c0_i32_1 = arith.constant 0 : i32
    return %c0_i32, %c0_i32_0 : i32, i32
  }
  func.func @transform_6(%arg0: i32, %arg1: i32) -> (i32, i32, i32) {
    %c0_i32 = arith.constant 0 : i32
    %c0_i32_0 = arith.constant 0 : i32
    return %arg0, %arg1, %c0_i32 : i32, i32, i32
  }
}

</mosaic_0001>

<bundles_post_ra>
// kernel: up_forward.1
= control target key start
LH: loop header
LB: loop body
LE: loop exit
PB: predicated region body
PF: predicated region fallthrough
CT: control target
= control target key end

     0   :  { %s3799_s21 = smov 0   ;;  %s3801_s22 = smov 0   ;;  %s5451_s0 = inlined_call_operand.vmem [shape: bf16[2,20,18,32], index: 0, kind: input, shape index: {}]   ;;  %s5452_s1 = inlined_call_operand.vmem [shape: bf16[2,20,18,32], index: 1, kind: input, shape index: {}]   ;;  %s5453_s2 = inlined_call_operand.vmem [shape: bf16[576,32], index: 2, kind: input, shape index: {}]   ;;  %s5454_s3 = inlined_call_operand.vmem [shape: f32[1,32], index: 3, kind: input, shape index: {}]   ;;  %s5455_s4 = inlined_call_operand.vmem [shape: bf16[288,128], index: 4, kind: input, shape index: {}]   ;;  %s5456_s5 = inlined_call_operand.vmem [shape: f32[1,128], index: 5, kind: input, shape index: {}]   ;;  %s5457_s6 = inlined_call_operand.vmem [shape: bf16[2,256,128], index: 6, kind: output, shape index: {}]  }
   0x1   :  { %s3803_s23 = smov 0   ;;  %s3805_s24 = smov 0  }
   0x2   :  { %s3807_s25 = smov 0  }
   0x3 LB: > { %s25_s26 = sadd.s32 1, %s3750_s23  ;;  %s28_s27 = sadd.s32 1, %s3754_s24  ;;  %s3758_s25 = sphi %s3807_s25, %s16_s25   ;;  %s3754_s24 = sphi %s3805_s24, %s5495_s24   ;;  %s3750_s23 = sphi %s3803_s23, %s5494_s23   ;;  %s3746_s22 = sphi %s3801_s22, %s5493_s22   ;;  %s3742_s21 = sphi %s3799_s21, %s5492_s21  }
   0x4   : > { %p26_p0 = scmp.ge.s32.totalorder %s25_s26, 2  ;;  %p3203_p1 = scmp.ge.s32.totalorder %s3758_s25, 1 }
   0x5   : > { %p236_p2 = scmp.lt.s32.totalorder %s3758_s25, 5 }
   0x6   : > { %s5497_s26 = smov (%p26_p0, %s25_s26), 0  ;;  %s5499_s27 = smov (!%p26_p0, %s28_s27), %s3754_s24 }
   0x7   : > { %p237_p3 = pnand %p3203_p1, %p236_p2  ;;  %p30_p4 = scmp.ge.s32.totalorder %s5499_s27, 2 }
   0x9   : > { %s5501_s27 = smov (%p30_p4, %s5499_s27), 0  ;;  %240 = sbr.rel (%p237_p3) target bundleno = 882 (0x372), region = 44 }
   0xe   : > { %p275_p5 = scmp.lt.s32.totalorder %s3746_s22, 1  ;;  %s3546_s28 = smul.u32 96, %s3742_s21  ;;  %vm524_vm0 = vsmask.f32 7424  ;;  %vm835_vm1 = vcmask 1046528   ;;  %vm1114_vm2 = vcmask 261120  }
   0xf   : > { %s3760_s14 = smov 32   ;;  %s3761_s15 = smov 96   ;;  %vm1135_vm3 = vcmask 523264   ;;  %vm1156_vm4 = vcmask 785408   ;;  %vm2323_vm10 = vcmask 1040384  }
  0x10   : > { %s5503_s22 = smov (!%p275_p5, %s3746_s22), 1  ;;  %s3762_s16 = smov 64   ;;  %vm2324_vm11 = vsmask.f32 256 }
  0x11   : > { %s3673_s29 = smul.u32 240, %s5503_s22  ;;  %vm4931_vm12 = vmand %vm2323_vm10, %vm2324_vm11 }
  0x13   : > { %s284_s8 = scalar_lea.vmem %s5452_s1, %s3673_s29  ;;  %s279_s11 = scalar_lea.vmem %s5451_s0, %s3673_s29 }
  0x14   : > { %s3841_s12 = scalar_lea.vmem %s284_s8, %s3546_s28  ;;  %s3843_s13 = scalar_lea.vmem %s279_s11, %s3546_s28 }
  0x15   : > { %v3846_v0 = vld [vmem:[%s3841_s12] sm:$0xff]  ;;  %v340_v1 = vld [vmem:[%s3841_s12 + $0x8] sm:$0x1]  ;;  %v3850_v2 = vld [vmem:[%s3843_s13 + $0xc] sm:$0xff]  ;;  %s3207_s11 = sshll.u32 %s5503_s22, 5 }
  0x16   : > { %v675_v3 = vunpack.c.l.b16 %v340_v1  ;;  %v305_v4 = vld [vmem:[%s3843_s13 + $0x14] sm:$0x1]  ;;  %v3854_v5 = vld [vmem:[%s3843_s13] sm:$0xff]  ;;  %v302_v6 = vld [vmem:[%s3843_s13 + $0x8] sm:$0x1]  ;;  %474 = vrot.lane.b32.xlu0 %v3846_v0, %s3760_s14  ;;  %v696_v7 = vshrl.u32 %v3846_v0, 16 }
  0x17   : > { %v698_v8 = vshll.u32 %v3846_v0, 16  ;;  %v505_v9 = vunpack.c.l.b16 %v305_v4  ;;  %v538_v10 = vshrl.u32 %v3850_v2, 16  ;;  %v343_v11 = vld [vmem:[%s3841_s12 + $0x14] sm:$0x1]  ;;  %v540_v13 = vshll.u32 %v3850_v2, 16  ;;  %v3868_v16 = vld [vmem:[%s3841_s12 + $0xc] sm:$0xff] }
  0x18   : > { %v3863_v12 = vpack.c.b16 %v675_v3, %v675_v3  ;;  %v504_v14 = vunpack.c.l.b16 %v302_v6  ;;  %v526_v15 = vshrl.u32 %v3854_v5, 16  ;;  %v528_v19 = vshll.u32 %v3854_v5, 16  ;;  %v308_v25 = vld [vmem:[%s3843_s13 + $0x20] sm:$0x1]  ;;  %v3884_v34 = vld [vmem:[%s3843_s13 + $0x18] sm:$0xff]  ;;  %v3909_v55 = vld [vmem:[%s3843_s13 + $0x24] sm:$0xff] }
  0x19   : > { %v700_v17 = vrot.slane %v698_v8, 1  ;;  %v3870_v18 = vpack.c.b16 %v505_v9, %v505_v9  ;;  %v676_v20 = vunpack.c.l.b16 %v343_v11  ;;  %v542_v22 = vrot.slane %v540_v13, 1  ;;  %v3888_v38 = vld [vmem:[%s3841_s12 + $0x18] sm:$0xff]  ;;  %v346_v40 = vld [vmem:[%s3841_s12 + $0x20] sm:$0x1]  ;;  %v3919_v1 = vld [vmem:[%s3841_s12 + $0x24] sm:$0xff] }
  0x1a   : > { %v703_v21 = vshll.u32 %v3863_v12, 16  ;;  %v3874_v23 = vpack.c.b16 %v504_v14, %v504_v14  ;;  %v708_v24 = vshrl.u32 %v3868_v16, 16  ;;  %v530_v28 = vrot.slane %v528_v19, 1  ;;  %v311_v49 = vld [vmem:[%s3843_s13 + $0x2c] sm:$0x1] }
  0x1b   : > { %v701_v26 = vor.u32 %v700_v17, %v696_v7  ;;  %v545_v27 = vshll.u32 %v3870_v18, 16  ;;  %v3879_v29 = vpack.c.b16 %v676_v20, %v676_v20  ;;  %v543_v31 = vor.u32 %v542_v22, %v538_v10  ;;  %v349_v54 = vld [vmem:[%s3841_s12 + $0x2c] sm:$0x1]  ;;  %v314_v14 = vld [vmem:[%s3843_s13 + $0x38] sm:$0x1] }
  0x1c   : > { %v705_v30 = vrot.slane %v703_v21, 1  ;;  %v533_v32 = vshll.u32 %v3874_v23, 16  ;;  %v710_v33 = vshll.u32 %v3868_v16, 16  ;;  %v531_v36 = vor.u32 %v530_v28, %v526_v15  ;;  %v352_v15 = vld [vmem:[%s3841_s12 + $0x38] sm:$0x1] }
  0x1d   : > { %v547_v35 = vrot.slane %v545_v27, 1  ;;  %v715_v37 = vshll.u32 %v3879_v29, 16  ;;  %v506_v39 = vunpack.c.l.b16 %v308_v25  ;;  %v552_v47 = vshll.u32 %v3884_v34, 16 }
  0x1e   : > { %v706_v41 = vsel %vm524_vm0, %v701_v26, %v705_v30  ;;  %v535_v42 = vrot.slane %v533_v32, 1  ;;  %v712_v43 = vrot.slane %v710_v33, 1  ;;  %v677_v48 = vunpack.c.l.b16 %v346_v40  ;;  %v3949_v30 = vld [vmem:[%s3841_s12 + $0x30] sm:$0xff] }
  0x1f   : > { %815 = vrot.lane.b32.xlu1 %v706_v41, %s3761_s15  ;;  %v3894_v44 = vsel %vm524_vm0, %v543_v31, %v547_v35  ;;  %v3899_v46 = vpack.c.b16 %v506_v39, %v506_v39  ;;  %v717_v51 = vrot.slane %v715_v37, 1  ;;  %v722_v52 = vshll.u32 %v3888_v38, 16 }
  0x20   : > { %647 = vrot.lane.b32.xlu2 %v3894_v44, %s3762_s16  ;;  %v536_v45 = vsel %vm524_vm0, %v531_v36, %v535_v42  ;;  %v713_v50 = vor.u32 %v712_v43, %v708_v24  ;;  %v3905_v53 = vpack.c.b16 %v677_v48, %v677_v48  ;;  %v507_v56 = vunpack.c.l.b16 %v311_v49  ;;  %v3942_v24 = vld [vmem:[%s3843_s13 + $0x30] sm:$0xff]  ;;  %v317_v42 = vld [vmem:[%s3843_s13 + $0x44] sm:$0x1]  ;;  %v3970_v48 = vld [vmem:[%s3843_s13 + $0x3c] sm:$0xff] }
  0x21   : > { %645 = vrot.lane.b32.xlu0 %v536_v45, %s3762_s16  ;;  %v550_v57 = vshrl.u32 %v3884_v34, 16  ;;  %v554_v58 = vrot.slane %v552_v47, 1  ;;  %v557_v59 = vshll.u32 %v3899_v46, 16  ;;  %v720_v60 = vshrl.u32 %v3888_v38, 16  ;;  %v355_v43 = vld [vmem:[%s3841_s12 + $0x44] sm:$0x1] }
  0x22   : > { %v3915_v61 = vsel %vm524_vm0, %v713_v50, %v717_v51  ;;  %v724_v62 = vrot.slane %v722_v52, 1  ;;  %v727_v63 = vshll.u32 %v3905_v53, 16  ;;  %v678_v3 = vunpack.c.l.b16 %v349_v54 }
  0x23   : > { %v3923_v4 = vpack.c.b16 %v507_v56, %v507_v56  ;;  %v564_v6 = vshll.u32 %v3909_v55, 16  ;;  %v555_v7 = vor.u32 %v554_v58, %v550_v57  ;;  %v559_v8 = vrot.slane %v557_v59, 1  ;;  %v3979_v58 = vld [vmem:[%s3841_s12 + $0x3c] sm:$0xff] }
  0x24   : > { %v725_v9 = vor.u32 %v724_v62, %v720_v60  ;;  %v729_v10 = vrot.slane %v727_v63, 1  ;;  %v3930_v11 = vpack.c.b16 %v678_v3, %v678_v3  ;;  %v734_v13 = vshll.u32 %v3919_v1, 16 }
  0x25   : > { %v562_v17 = vshrl.u32 %v3909_v55, 16  ;;  %v566_v19 = vrot.slane %v564_v6, 1  ;;  %v569_v20 = vshll.u32 %v3923_v4, 16  ;;  %v3938_v21 = vsel %vm524_vm0, %v555_v7, %v559_v8 }
  0x26   : > { %v732_v22 = vshrl.u32 %v3919_v1, 16  ;;  %v508_v25 = vunpack.c.l.b16 %v314_v14  ;;  %v3945_v26 = vsel %vm524_vm0, %v725_v9, %v729_v10  ;;  %v736_v27 = vrot.slane %v734_v13, 1  ;;  %v320_v10 = vld [vmem:[%s3843_s13 + $0x50] sm:$0x1] }
  0x27   : > { %476 = vrot.lane.b32.xlu1 %v3868_v16, %s3760_s14  ;;  %v739_v28 = vshll.u32 %v3930_v11, 16  ;;  %v679_v31 = vunpack.c.l.b16 %v352_v15  ;;  %v567_v32 = vor.u32 %v566_v19, %v562_v17  ;;  %v571_v33 = vrot.slane %v569_v20, 1  ;;  %v358_v13 = vld [vmem:[%s3841_s12 + $0x50] sm:$0x1]  ;;  %v3997_v17 = vld [vmem:[%s3843_s13 + $0x48] sm:$0xff] }
  0x28   : > { %817 = vrot.lane.b32.xlu2 %v3915_v61, %s3761_s15  ;;  %v3955_v35 = vpack.c.b16 %v508_v25, %v508_v25  ;;  %v576_v36 = vshll.u32 %v3942_v24, 16  ;;  %v737_v37 = vor.u32 %v736_v27, %v732_v22  ;;  %v746_v41 = vshll.u32 %v3949_v30, 16  ;;  %v4004_v22 = vld [vmem:[%s3841_s12 + $0x48] sm:$0xff] }
  0x29   : > { %478 = vrot.lane.b32.xlu0 %v3888_v38, %s3760_s14  ;;  %v741_v39 = vrot.slane %v739_v28, 1  ;;  %v3960_v40 = vpack.c.b16 %v679_v31, %v679_v31  ;;  %v3966_v45 = vsel %vm524_vm0, %v567_v32, %v571_v33  ;;  %v574_v47 = vshrl.u32 %v3942_v24, 16 }
  0x2a   : > { %v578_v49 = vrot.slane %v576_v36, 1  ;;  %v581_v50 = vshll.u32 %v3955_v35, 16  ;;  %v744_v51 = vshrl.u32 %v3949_v30, 16  ;;  %v509_v52 = vunpack.c.l.b16 %v317_v42 }
  0x2b   : > { %v3975_v54 = vsel %vm524_vm0, %v737_v37, %v741_v39  ;;  %v748_v56 = vrot.slane %v746_v41, 1  ;;  %v751_v57 = vshll.u32 %v3960_v40, 16  ;;  %v680_v59 = vunpack.c.l.b16 %v355_v43 }
  0x2c   : > { %v588_v60 = vshll.u32 %v3970_v48, 16  ;;  %v579_v62 = vor.u32 %v578_v49, %v574_v47  ;;  %v583_v63 = vrot.slane %v581_v50, 1  ;;  %v3986_v3 = vpack.c.b16 %v509_v52, %v509_v52  ;;  %v323_v47 = vld [vmem:[%s3843_s13 + $0x5c] sm:$0x1] }
  0x2d   : > { %v749_v6 = vor.u32 %v748_v56, %v744_v51  ;;  %v753_v7 = vrot.slane %v751_v57, 1  ;;  %v3990_v8 = vpack.c.b16 %v680_v59, %v680_v59  ;;  %v758_v9 = vshll.u32 %v3979_v58, 16  ;;  %v361_v51 = vld [vmem:[%s3841_s12 + $0x5c] sm:$0x1]  ;;  %v4028_v59 = vld [vmem:[%s3843_s13 + $0x54] sm:$0xff] }
  0x2e   : > { %v586_v14 = vshrl.u32 %v3970_v48, 16  ;;  %v590_v15 = vrot.slane %v588_v60, 1  ;;  %v4000_v19 = vsel %vm524_vm0, %v579_v62, %v583_v63  ;;  %v593_v20 = vshll.u32 %v3986_v3, 16 }
  0x2f   : > { %649 = vrot.lane.b32.xlu1 %v3938_v21, %s3762_s16  ;;  %5462 = vst [vmem:[#allocation2_spill] sm:$0xff] %v4000_v19  ;;  %v510_v25 = vunpack.c.l.b16 %v320_v10  ;;  %v681_v27 = vunpack.c.l.b16 %v358_v13  ;;  %v4007_v28 = vsel %vm524_vm0, %v749_v6, %v753_v7  ;;  %v756_v31 = vshrl.u32 %v3979_v58, 16  ;;  %v4039_v10 = vld [vmem:[%s3841_s12 + $0x54] sm:$0xff] }
  0x30   : > { %819 = vrot.lane.b32.xlu2 %v3945_v26, %s3761_s15  ;;  %v760_v32 = vrot.slane %v758_v9, 1  ;;  %v763_v33 = vshll.u32 %v3990_v8, 16  ;;  %v591_v36 = vor.u32 %v590_v15, %v586_v14  ;;  %v600_v37 = vshll.u32 %v3997_v17, 16 }
  0x31   : > { %480 = vrot.lane.b32.xlu0 %v3919_v1, %s3760_s14  ;;  %v595_v39 = vrot.slane %v593_v20, 1  ;;  %v4016_v41 = vpack.c.b16 %v510_v25, %v510_v25  ;;  %v4018_v42 = vpack.c.b16 %v681_v27, %v681_v27  ;;  %v770_v43 = vshll.u32 %v4004_v22, 16 }
  0x32   : > { %v761_v49 = vor.u32 %v760_v32, %v756_v31  ;;  %v765_v50 = vrot.slane %v763_v33, 1  ;;  %v598_v52 = vshrl.u32 %v3997_v17, 16  ;;  %v602_v56 = vrot.slane %v600_v37, 1  ;;  %v364_v37 = vld [vmem:[%s3841_s12 + $0x68] sm:$0x1] }
  0x33   : > { %v768_v57 = vshrl.u32 %v4004_v22, 16  ;;  %v511_v60 = vunpack.c.l.b16 %v323_v47  ;;  %v4031_v62 = vsel %vm524_vm0, %v591_v36, %v595_v39  ;;  %v605_v63 = vshll.u32 %v4016_v41, 16  ;;  %v326_v36 = vld [vmem:[%s3843_s13 + $0x68] sm:$0x1] }
  0x34   : > { %5463 = vst [vmem:[#allocation3_spill] sm:$0xff] %v4031_v62  ;;  %v772_v6 = vrot.slane %v770_v43, 1  ;;  %v775_v7 = vshll.u32 %v4018_v42, 16  ;;  %v4036_v9 = vsel %vm524_vm0, %v761_v49, %v765_v50  ;;  %v682_v13 = vunpack.c.l.b16 %v361_v51 }
  0x35   : > { %v4043_v14 = vpack.c.b16 %v511_v60, %v511_v60  ;;  %v612_v15 = vshll.u32 %v4028_v59, 16  ;;  %v603_v20 = vor.u32 %v602_v56, %v598_v52  ;;  %v607_v25 = vrot.slane %v605_v63, 1  ;;  %v4065_v52 = vld [vmem:[%s3843_s13 + $0x60] sm:$0xff] }
  0x36   : > { %v773_v27 = vor.u32 %v772_v6, %v768_v57  ;;  %v777_v31 = vrot.slane %v775_v7, 1  ;;  %v4050_v32 = vpack.c.b16 %v682_v13, %v682_v13  ;;  %v782_v33 = vshll.u32 %v4039_v10, 16  ;;  %v4069_v63 = vld [vmem:[%s3841_s12 + $0x60] sm:$0xff] }
  0x37   : > { %651 = vrot.lane.b32.xlu1 %v3966_v45, %s3762_s16  ;;  %v610_v39 = vshrl.u32 %v4028_v59, 16  ;;  %v614_v43 = vrot.slane %v612_v15, 1  ;;  %v617_v47 = vshll.u32 %v4043_v14, 16  ;;  %v4058_v49 = vsel %vm524_vm0, %v603_v20, %v607_v25 }
  0x38   : > { %821 = vrot.lane.b32.xlu2 %v3975_v54, %s3761_s15  ;;  %5464 = vst [vmem:[#allocation4_spill] sm:$0xff] %v4058_v49  ;;  %v4061_v50 = vsel %vm524_vm0, %v773_v27, %v777_v31  ;;  %v780_v51 = vshrl.u32 %v4039_v10, 16  ;;  %v512_v56 = vunpack.c.l.b16 %v326_v36  ;;  %v784_v57 = vrot.slane %v782_v33, 1 }
  0x39   : > { %482 = vrot.lane.b32.xlu0 %v3949_v30, %s3760_s14  ;;  %v787_v60 = vshll.u32 %v4050_v32, 16  ;;  %v683_v6 = vunpack.c.l.b16 %v364_v37  ;;  %v866_v7 = vrot.slane %v3846_v0, 1  ;;  %v867_v13 = vrot.slane %v3863_v12, 1  ;;  %v329_v37 = vld [vmem:[%s3843_s13 + $0x74] sm:$0x1] }
  0x3a   : > { %v615_v15 = vor.u32 %v614_v43, %v610_v39  ;;  %v619_v20 = vrot.slane %v617_v47, 1  ;;  %v4077_v25 = vpack.c.b16 %v512_v56, %v512_v56  ;;  %v624_v27 = vshll.u32 %v4065_v52, 16  ;;  %v3579_v39 = vld [vmem:[%s5453_s2 + $0x38] sm:$0xff]  ;;  %v367_v43 = vld [vmem:[%s3841_s12 + $0x74] sm:$0x1] }
  0x3b   : > { %v4081_v31 = vsel %vm835_vm1, %v866_v7, %v867_v13  ;;  %v785_v0 = vor.u32 %v784_v57, %v780_v51  ;;  %v789_v12 = vrot.slane %v787_v60, 1  ;;  %v4085_v33 = vpack.c.b16 %v683_v6, %v683_v6  ;;  %1773 = vmatpush.bf16.msra.mxu0 %v3579_v39  ;;  %v4100_v60 = vld [vmem:[%s3843_s13 + $0x6c] sm:$0xff] }
  0x3c   : > { %v794_v36 = vshll.u32 %v4069_v63, 16  ;;  %v4094_v47 = vsel %vm524_vm0, %v615_v15, %v619_v20  ;;  %v622_v56 = vshrl.u32 %v4065_v52, 16  ;;  %v626_v7 = vrot.slane %v624_v27, 1 }
  0x3d   : > { %5465 = vst [vmem:[#allocation5_spill] sm:$0xff] %v4094_v47  ;;  %v629_v51 = vshll.u32 %v4077_v25, 16  ;;  %v792_v57 = vshrl.u32 %v4069_v63, 16  ;;  %v513_v6 = vunpack.c.l.b16 %v329_v37  ;;  %v4103_v13 = vsel %vm524_vm0, %v785_v0, %v789_v12 }
  0x3e   : > { %v684_v15 = vunpack.c.l.b16 %v367_v43  ;;  %v627_v20 = vor.u32 %v626_v7, %v622_v56  ;;  %v636_v37 = vshll.u32 %v4100_v60, 16  ;;  %v3577_v56 = vld [vmem:[%s5453_s2 + $0x28] sm:$0xff] }
  0x3f   : > { %653 = vrot.lane.b32.xlu1 %v4000_v19, %s3762_s16  ;;  %v4107_v19 = vld [vmem:[%s3841_s12 + $0x6c] sm:$0xff]  ;;  %v631_v27 = vrot.slane %v629_v51, 1  ;;  %v4113_v39 = vpack.c.b16 %v513_v6, %v513_v6  ;;  %v634_v51 = vshrl.u32 %v4100_v60, 16 }
  0x40   : > { %823 = vrot.lane.b32.xlu2 %v4007_v28, %s3761_s15  ;;  %v806_v43 = vshll.u32 %v4107_v19, 16  ;;  %v804_v6 = vshrl.u32 %v4107_v19, 16 }
  0x41   : > { %484 = vrot.lane.b32.xlu0 %v3979_v58, %s3760_s14  ;;  %v4128_v7 = vsel %vm524_vm0, %v627_v20, %v631_v27 }
  0x47   : > { %655 = vrot.lane.b32.xlu1 %v4031_v62, %s3762_s16  ;;  %v799_v62 = vshll.u32 %v4085_v33, 16 }
  0x48   : > { %825 = vrot.lane.b32.xlu2 %v4036_v9, %s3761_s15 }
  0x49   : > { %486 = vrot.lane.b32.xlu0 %v4004_v22, %s3760_s14  ;;  %v801_v12 = vrot.slane %v799_v62, 1  ;;  %v641_v62 = vshll.u32 %v4113_v39, 16 }
  0x4b   : > { %v643_v27 = vrot.slane %v641_v62, 1  ;;  %v839_v62 = vrot.slane %v3850_v2, 1 }
  0x4f   : > { %657 = vrot.lane.b32.xlu1 %v4058_v49, %s3762_s16  ;;  %v796_v49 = vrot.slane %v794_v36, 1  ;;  %v4118_v36 = vpack.c.b16 %v684_v15, %v684_v15  ;;  %v808_v15 = vrot.slane %v806_v43, 1  ;;  %v3603_v43 = vld [vmem:[%s5453_s2 + $0xf8] sm:$0xff] }
  0x50   : > { %827 = vrot.lane.b32.xlu2 %v4061_v50, %s3761_s15  ;;  %1950 = vmatpush.bf16.msra.mxu3 %v3603_v43  ;;  %v3599_v43 = vld [vmem:[%s5453_s2 + $0xd8] sm:$0xff] }
  0x51   : > { %488 = vrot.lane.b32.xlu0 %v4039_v10, %s3760_s14  ;;  %v797_v0 = vor.u32 %v796_v49, %v792_v57  ;;  %v638_v49 = vrot.slane %v636_v37, 1  ;;  %v809_v37 = vor.u32 %v808_v15, %v804_v6  ;;  %v840_v6 = vrot.slane %v3870_v18, 1  ;;  %v3601_v18 = vld [vmem:[%s5453_s2 + $0xe8] sm:$0xff] }
  0x52   : > { %v869_v15 = vrot.slane %v3868_v16, 1 }
  0x53   : > { %v4133_v57 = vsel %vm524_vm0, %v797_v0, %v801_v12  ;;  %v639_v20 = vor.u32 %v638_v49, %v634_v51  ;;  %v3576_v12 = vld [vmem:[%s5453_s2 + $0x20] sm:$0xff] }
  0x55   : > { %v4153_v51 = vsel %vm524_vm0, %v639_v20, %v643_v27  ;;  %v3602_v20 = vld [vmem:[%s5453_s2 + $0xf0] sm:$0xff] }
  0x56   : > { %v3574_v27 = vld [vmem:[%s5453_s2 + $0x10] sm:$0xff]  ;;  %1951 = vmatpush.bf16.msra.mxu3 %v3602_v20  ;;  %v873_v20 = vrot.slane %v3905_v53, 1 }
  0x57   : > { %659 = vrot.lane.b32.xlu1 %v4094_v47, %s3762_s16  ;;  %v3578_v47 = vld [vmem:[%s5453_s2 + $0x30] sm:$0xff] }
  0x58   : > { %829 = vrot.lane.b32.xlu2 %v4103_v13, %s3761_s15  ;;  %1774 = vmatpush.bf16.msra.mxu0 %v3578_v47  ;;  %v811_v47 = vshll.u32 %v4118_v36, 16 }
  0x59   : > { %490 = vrot.lane.b32.xlu0 %v4069_v63, %s3760_s14 }
  0x5a   : > { %v813_v0 = vrot.slane %v811_v47, 1  ;;  %v870_v47 = vrot.slane %v3879_v29, 1  ;;  %v3573_v29 = vld [vmem:[%s5453_s2 + $0x8] sm:$0xff]  ;;  %1952 = vmatpush.bf16.msra.mxu3 %v3601_v18 }
  0x5c   : > { %1775 = vmatpush.bf16.msra.mxu0 %v3577_v56  ;;  %v3575_v56 = vld [vmem:[%s5453_s2 + $0x18] sm:$0xff]  ;;  %v4156_v49 = vsel %vm524_vm0, %v809_v37, %v813_v0  ;;  %v871_v37 = vsel %vm835_vm1, %v869_v15, %v870_v47  ;;  %v3600_v0 = vld [vmem:[%s5453_s2 + $0xe0] sm:$0xff]  ;;  %v872_v47 = vrot.slane %v3888_v38, 1 }
  0x5e   : > { %1953 = vmatpush.bf16.msra.mxu3 %v3600_v0  ;;  %v874_v18 = vsel %vm835_vm1, %v872_v47, %v873_v20 }
  0x5f   : > { %661 = vrot.lane.b32.xlu1 %v4128_v7, %s3762_s16 }
  0x60   : > { %831 = vrot.lane.b32.xlu2 %v4133_v57, %s3761_s15  ;;  %1776 = vmatpush.bf16.msra.mxu0 %v3576_v12  ;;  %v3572_v12 = vld [vmem:[%s5453_s2] sm:$0xff] }
  0x61   : > { %492 = vrot.lane.b32.xlu0 %v4107_v19, %s3760_s14 }
  0x62   : > { %1954 = vmatpush.bf16.msra.mxu3 %v3599_v43  ;;  %v846_v43 = vrot.slane %v3923_v4, 1 }
  0x64   : > { %1777 = vmatpush.bf16.msra.mxu0 %v3575_v56  ;;  %v3607_v56 = vld [vmem:[%s5453_s2 + $0x118] sm:$0xff] }
  0x67   : > { %663 = vrot.lane.b32.xlu1 %v4153_v51, %s3762_s16 }
  0x68   : > { %833 = vrot.lane.b32.xlu2 %v4156_v49, %s3761_s15  ;;  %1778 = vmatpush.bf16.msra.mxu0 %v3574_v27  ;;  %v3597_v27 = vld [vmem:[%s5453_s2 + $0xc8] sm:$0xff] }
  0x69   : > { %996 = vrot.lane.b32.xlu0 %v3915_v61, %s3760_s14  ;;  %v4178_v61 = vsel %vm835_vm1, %v839_v62, %v840_v6  ;;  %v843_v62 = vrot.slane %v3899_v46, 1  ;;  %v3598_v6 = vld [vmem:[%s5453_s2 + $0xd0] sm:$0xff] }
  0x6a   : > { %1955 = vmatpush.bf16.msra.mxu3 %v3598_v6 }
  0x6c   : > { %1779 = vmatpush.bf16.msra.mxu0 %v3573_v29 }
  0x6e   : > { %1956 = vmatpush.bf16.msra.mxu3 %v3597_v27 }
  0x6f   : > { %1019 = vrot.lane.b32.xlu1 %v4178_v61, %s3762_s16 }
  0x70   : > { %1042 = vrot.lane.b32.xlu2 %v871_v37, %s3761_s15  ;;  %1780 = vmatpush.bf16.msra.mxu0 %v3572_v12  ;;  %v845_v12 = vrot.slane %v3909_v55, 1 }
  0x71   : > { %896 = vrot.lane.b32.xlu0 %v4081_v31, %s3760_s14  ;;  %v842_v31 = vrot.slane %v3884_v34, 1 }
  0x74   : > { %2013 = vmatpush.bf16.msrb.mxu0 %v3607_v56  ;;  %v4237_v56 = vsel %vm835_vm1, %v845_v12, %v846_v43 }
  0x77   : > { %921 = vrot.lane.b32.xlu1 %v3850_v2, %s3762_s16 }
  0x78   : > { %946 = vrot.lane.b32.xlu2 %v3868_v16, %s3761_s15  ;;  %v4215_v16 = vsel %vm835_vm1, %v842_v31, %v843_v62 }
  0x79   : > { %1361 = vrot.lane.b32.xlu0 %v3905_v53, %s3760_s14  ;;  %v3596_v53 = vld [vmem:[%s5453_s2 + $0xc0] sm:$0xff] }
  0x7a   : > { %v648_v15 = vpop.permute.xlu2 %647  ;;  %1957 = vmatpush.bf16.msra.mxu3 %v3596_v53 }
  0x7f   : > { %998 = vrot.lane.b32.xlu1 %v3945_v26, %s3760_s14 }
  0x80   : > { %1021 = vrot.lane.b32.xlu2 %v4215_v16, %s3762_s16 }
  0x81   : > { %1044 = vrot.lane.b32.xlu0 %v874_v18, %s3761_s15 }
  0x82   : > { %v818_v29 = vpop.permute.xlu2 %817 }
  0x87   : > { %898 = vrot.lane.b32.xlu1 %v871_v37, %s3760_s14  ;;  %v875_v37 = vrot.slane %v3919_v1, 1 }
  0x88   : > { %923 = vrot.lane.b32.xlu2 %v3884_v34, %s3762_s16  ;;  %v475_v26 = vpop.permute.xlu0 %474 }
  0x89   : > { %948 = vrot.lane.b32.xlu0 %v3888_v38, %s3761_s15  ;;  %v876_v38 = vrot.slane %v3930_v11, 1  ;;  %v1116_v6 = vsel %vm1114_vm2, %v3854_v5, %v475_v26  ;;  %v3606_v26 = vld [vmem:[%s5453_s2 + $0x110] sm:$0xff] }
  0x8a   : > { %v820_v0 = vpop.permute.xlu2 %819  ;;  %2014 = vmatpush.bf16.msrb.mxu0 %v3606_v26 }
  0x8b   : > { %v877_v27 = vsel %vm835_vm1, %v875_v37, %v876_v38  ;;  %v849_v38 = vrot.slane %v3955_v35, 1 }
  0x8f   : > { %1363 = vrot.lane.b32.xlu1 %v3930_v11, %s3760_s14 }
  0x90   : > { %1000 = vrot.lane.b32.xlu2 %v3975_v54, %s3760_s14 }
  0x91   : > { %1023 = vrot.lane.b32.xlu0 %v4237_v56, %s3762_s16  ;;  %v816_v31 = vpop.permute.xlu1 %815 }
  0x92   : > { %v822_v62 = vpop.permute.xlu2 %821 }
  0x93   : > { %v646_v47 = vpop.permute.xlu0 %645 }
  0x94   : > { %v1137_v20 = vsel %vm1135_vm3, %v1116_v6, %v646_v47 }
  0x95   : > { %v1158_v54 = vsel %vm1156_vm4, %v1137_v20, %v816_v31 }
  0x96   : > { %1781 = vmatmul.bf16.vlgmr.msra.gmra.mxu0 %v1158_v54 }
  0x97   : > { %1046 = vrot.lane.b32.xlu1 %v877_v27, %s3761_s15 }
  0x98   : > { %900 = vrot.lane.b32.xlu2 %v874_v18, %s3760_s14  ;;  %v848_v18 = vrot.slane %v3942_v24, 1 }
  0x99   : > { %925 = vrot.lane.b32.xlu0 %v3909_v55, %s3762_s16  ;;  %v477_v11 = vpop.permute.xlu1 %476 }
  0x9a   : > { %v4256_v53 = vpop.permute.xlu2 %823  ;;  %v1118_v43 = vsel %vm1114_vm2, %v3850_v2, %v477_v11  ;;  %v878_v2 = vrot.slane %v3949_v30, 1  ;;  %v4284_v11 = vsel %vm835_vm1, %v848_v18, %v849_v38 }
  0x9b   : > { %v479_v12 = vpop.permute.xlu0 %478  ;;  %v1139_v47 = vsel %vm1135_vm3, %v1118_v43, %v648_v15  ;;  %v3595_v15 = vld [vmem:[%s5453_s2 + $0xb8] sm:$0xff] }
  0x9c   : > { %v4265_v37 = vsel %vm1114_vm2, %v3884_v34, %v479_v12  ;;  %v879_v34 = vrot.slane %v3960_v40, 1  ;;  %1891 = vmatpush.bf16.msra.mxu2 %v3595_v15  ;;  %v3587_v43 = vld [vmem:[%s5453_s2 + $0x78] sm:$0xff]  ;;  %v3592_v15 = vld [vmem:[%s5453_s2 + $0xa0] sm:$0xff] }
  0x9d   : > { %1832 = vmatpush.bf16.msra.mxu1 %v3587_v43 }
  0x9e   : > { %v880_v12 = vsel %vm835_vm1, %v878_v2, %v879_v34  ;;  %v852_v2 = vrot.slane %v3986_v3, 1  ;;  %v3586_v34 = vld [vmem:[%s5453_s2 + $0x70] sm:$0xff] }
  0x9f   : > { %950 = vrot.lane.b32.xlu1 %v3919_v1, %s3761_s15 }
  0xa0   : > { %1365 = vrot.lane.b32.xlu2 %v3960_v40, %s3760_s14 }
  0xa1   : > { %1002 = vrot.lane.b32.xlu0 %v4007_v28, %s3760_s14  ;;  %v650_v31 = vpop.permute.xlu1 %649  ;;  %v1161_v28 = vsel %vm1156_vm4, %v1139_v47, %v818_v29  ;;  %v881_v47 = vrot.slane %v3979_v58, 1  ;;  %1833 = vmatpush.bf16.msra.mxu1 %v3586_v34  ;;  %v3590_v34 = vld [vmem:[%s5453_s2 + $0x90] sm:$0xff] }
  0xa2   : > { %v1141_v6 = vsel %vm1135_vm3, %v4265_v37, %v650_v31  ;;  %v4279_v1 = vpop.permute.xlu2 %825  ;;  %v851_v31 = vrot.slane %v3970_v48, 1 }
  0xa3   : > { %v481_v20 = vpop.permute.xlu0 %480  ;;  %v1164_v54 = vsel %vm1156_vm4, %v1141_v6, %v820_v0  ;;  %v3593_v6 = vld [vmem:[%s5453_s2 + $0xa8] sm:$0xff] }
  0xa4   : > { %1958 = vmatmul.bf16.vlgmr.msra.gmra.mxu3 %v1164_v54  ;;  %v4299_v29 = vsel %vm1114_vm2, %v3909_v55, %v481_v20  ;;  %v882_v20 = vrot.slane %v3990_v8, 1 }
  0xa6   : > { %1786 = vmatmul.bf16.gmra.mxu0 %v1161_v28  ;;  %v883_v43 = vsel %vm835_vm1, %v881_v47, %v882_v20  ;;  %v3582_v47 = vld [vmem:[%s5453_s2 + $0x50] sm:$0xff]  ;;  %v854_v20 = vrot.slane %v3997_v17, 1 }
  0xa7   : > { %1025 = vrot.lane.b32.xlu1 %v4284_v11, %s3762_s16 }
  0xa8   : > { %1048 = vrot.lane.b32.xlu2 %v880_v12, %s3761_s15 }
  0xa9   : > { %902 = vrot.lane.b32.xlu0 %v877_v27, %s3760_s14  ;;  %v652_v40 = vpop.permute.xlu1 %651  ;;  %v3594_v27 = vld [vmem:[%s5453_s2 + $0xb0] sm:$0xff] }
  0xaa   : > { %v4295_v0 = vpop.permute.xlu2 %827  ;;  %v1143_v18 = vsel %vm1135_vm3, %v4299_v29, %v652_v40  ;;  %1892 = vmatpush.bf16.msra.mxu2 %v3594_v27  ;;  %v3585_v40 = vld [vmem:[%s5453_s2 + $0x68] sm:$0xff]  ;;  %v3584_v27 = vld [vmem:[%s5453_s2 + $0x60] sm:$0xff] }
  0xab   : > { %v483_v26 = vpop.permute.xlu0 %482  ;;  %v1167_v38 = vsel %vm1156_vm4, %v1143_v18, %v822_v62  ;;  %v4329_v62 = vsel %vm835_vm1, %v851_v31, %v852_v2  ;;  %1834 = vmatpush.bf16.msra.mxu1 %v3585_v40  ;;  %v3583_v2 = vld [vmem:[%s5453_s2 + $0x58] sm:$0xff]  ;;  %v855_v40 = vrot.slane %v4016_v41, 1 }
  0xae   : > { %1893 = vmatpush.bf16.msra.mxu2 %v3593_v6 }
  0xaf   : > { %927 = vrot.lane.b32.xlu1 %v3942_v24, %s3762_s16  ;;  %1835 = vmatpush.bf16.msra.mxu1 %v3584_v27  ;;  %v4391_v27 = vsel %vm835_vm1, %v854_v20, %v855_v40 }
  0xb0   : > { %952 = vrot.lane.b32.xlu2 %v3949_v30, %s3761_s15 }
  0xb1   : > { %1367 = vrot.lane.b32.xlu0 %v3990_v8, %s3760_s14  ;;  %v654_v55 = vpop.permute.xlu1 %653 }
  0xb2   : > { %v4324_v30 = vpop.permute.xlu2 %829  ;;  %1894 = vmatpush.bf16.msra.mxu2 %v3592_v15 }
  0xb3   : > { %v485_v28 = vpop.permute.xlu0 %484  ;;  %1836 = vmatpush.bf16.msra.mxu1 %v3583_v2  ;;  %v884_v2 = vrot.slane %v4004_v22, 1 }
  0xb4   : > { %1963 = vmatmul.bf16.gmra.mxu3 %v1167_v38 }
  0xb6   : > { %1791 = vmatmul.bf16.gmra.mxu0 %v1164_v54  ;;  %v3591_v54 = vld [vmem:[%s5453_s2 + $0x98] sm:$0xff] }
  0xb7   : > { %1004 = vrot.lane.b32.xlu1 %v4036_v9, %s3760_s14  ;;  %v4353_v9 = vsel %vm1114_vm2, %v3942_v24, %v483_v26  ;;  %1895 = vmatpush.bf16.msra.mxu2 %v3591_v54  ;;  %v3605_v54 = vld [vmem:[%s5453_s2 + $0x108] sm:$0xff] }
  0xb8   : > { %1027 = vrot.lane.b32.xlu2 %v4329_v62, %s3762_s16  ;;  %v1145_v6 = vsel %vm1135_vm3, %v4353_v9, %v654_v55  ;;  %1837 = vmatpush.bf16.msra.mxu1 %v3582_v47 }
  0xb9   : > { %1050 = vrot.lane.b32.xlu0 %v883_v43, %s3761_s15  ;;  %v656_v8 = vpop.permute.xlu1 %655  ;;  %v1170_v26 = vsel %vm1156_vm4, %v1145_v6, %v4256_v53  ;;  %v3588_v53 = vld [vmem:[%s5453_s2 + $0x80] sm:$0xff]  ;;  %2015 = vmatpush.bf16.msrb.mxu0 %v3605_v54  ;;  %v888_v54 = vrot.slane %v4050_v32, 1 }
  0xba   : > { %v4349_v18 = vpop.permute.xlu2 %831  ;;  %v3580_v6 = vld [vmem:[%s5453_s2 + $0x40] sm:$0xff] }
  0xbb   : > { %v4355_v31 = vpop.permute.xlu0 %486  ;;  %1896 = vmatpush.bf16.msra.mxu2 %v3590_v34  ;;  %v885_v34 = vrot.slane %v4018_v42, 1 }
  0xbf   : > { %904 = vrot.lane.b32.xlu1 %v880_v12, %s3760_s14  ;;  %v3589_v12 = vld [vmem:[%s5453_s2 + $0x88] sm:$0xff] }
  0xc0   : > { %929 = vrot.lane.b32.xlu2 %v3970_v48, %s3762_s16  ;;  %1897 = vmatpush.bf16.msra.mxu2 %v3589_v12  ;;  %v4411_v12 = vsel %vm1114_vm2, %v3970_v48, %v485_v28 }
  0xc1   : > { %954 = vrot.lane.b32.xlu0 %v3979_v58, %s3761_s15  ;;  %v658_v24 = vpop.permute.xlu1 %657  ;;  %v3581_v58 = vld [vmem:[%s5453_s2 + $0x48] sm:$0xff]  ;;  %v1147_v20 = vsel %vm1135_vm3, %v4411_v12, %v656_v8  ;;  %v858_v8 = vrot.slane %v4043_v14, 1 }
  0xc2   : > { %v4378_v55 = vpop.permute.xlu2 %833  ;;  %1838 = vmatpush.bf16.msra.mxu1 %v3581_v58  ;;  %v1173_v48 = vsel %vm1156_vm4, %v1147_v20, %v4279_v1  ;;  %v887_v1 = vrot.slane %v4039_v10, 1  ;;  %v836_v20 = vrot.slane %v3854_v5, 1 }
  0xc3   : > { %v4382_v15 = vpop.permute.xlu0 %488 }
  0xc4   : > { %1968 = vmatmul.bf16.gmra.mxu3 %v1170_v26  ;;  %1898 = vmatpush.bf16.msra.mxu2 %v3588_v53 }
  0xc6   : > { %1796 = vmatmul.bf16.gmra.mxu0 %v1167_v38  ;;  %1839 = vmatpush.bf16.msra.mxu1 %v3580_v6  ;;  %v889_v6 = vsel %vm835_vm1, %v887_v1, %v888_v54 }
  0xc7   : > { %1369 = vrot.lane.b32.xlu1 %v4018_v42, %s3760_s14  ;;  %v886_v42 = vsel %vm835_vm1, %v884_v2, %v885_v34  ;;  %v4446_v34 = vsel %vm1114_vm2, %v3997_v17, %v4355_v31 }
  0xc8   : > { %1006 = vrot.lane.b32.xlu2 %v4061_v50, %s3760_s14 }
  0xc9   : > { %1029 = vrot.lane.b32.xlu0 %v4391_v27, %s3762_s16  ;;  %v4404_v38 = vpop.permute.xlu1 %659 }
  0xca   : > { %v1043_v47 = vpop.permute.xlu2 %1042 }
  0xcb   : > { %v4413_v50 = vpop.permute.xlu0 %490 }
  0xcf   : > { %1052 = vrot.lane.b32.xlu1 %v886_v42, %s3761_s15 }
  0xd0   : > { %906 = vrot.lane.b32.xlu2 %v883_v43, %s3760_s14  ;;  %v857_v43 = vrot.slane %v4028_v59, 1 }
  0xd1   : > { %931 = vrot.lane.b32.xlu0 %v3997_v17, %s3762_s16  ;;  %v4422_v40 = vpop.permute.xlu1 %661 }
  0xd2   : > { %v947_v28 = vpop.permute.xlu2 %946 }
  0xd3   : > { %v4426_v58 = vpop.permute.xlu0 %492 }
  0xd4   : > { %1973 = vmatmul.bf16.gmra.mxu3 %v1173_v48 }
  0xd6   : > { %1801 = vmatmul.bf16.gmra.mxu0 %v1170_v26 }
  0xd7   : > { %956 = vrot.lane.b32.xlu1 %v4004_v22, %s3761_s15  ;;  %v4441_v22 = vsel %vm835_vm1, %v857_v43, %v858_v8  ;;  %v837_v43 = vrot.slane %v3874_v23, 1 }
  0xd8   : > { %1371 = vrot.lane.b32.xlu2 %v4050_v32, %s3760_s14  ;;  %v1149_v32 = vsel %vm1135_vm3, %v4446_v34, %v658_v24 }
  0xd9   : > { %1008 = vrot.lane.b32.xlu0 %v4103_v13, %s3760_s14  ;;  %v4436_v53 = vpop.permute.xlu1 %663  ;;  %v838_v24 = vsel %vm835_vm1, %v836_v20, %v837_v43  ;;  %v3604_v43 = vld [vmem:[%s5453_s2 + $0x100] sm:$0xff] }
  0xda   : > { %v1022_v26 = vpop.permute.xlu2 %1021  ;;  %2016 = vmatpush.bf16.msrb.mxu0 %v3604_v43 }
  0xdb   : > { %v997_v2 = vpop.permute.xlu0 %996 }
  0xdc   : > { %v1269_v13 = vsel %vm1114_vm2, %v3894_v44, %v997_v2  ;;  %v1176_v44 = vsel %vm1156_vm4, %v1149_v32, %v4295_v0  ;;  %v860_v0 = vrot.slane %v4065_v52, 1 }
  0xdf   : > { %1031 = vrot.lane.b32.xlu1 %v4441_v22, %s3762_s16 }
  0xe0   : > { %1054 = vrot.lane.b32.xlu2 %v889_v6, %s3761_s15 }
  0xe1   : > { %908 = vrot.lane.b32.xlu0 %v886_v42, %s3760_s14  ;;  %v1020_v17 = vpop.permute.xlu1 %1019 }
  0xe2   : > { %v1298_v31 = vsel %vm1135_vm3, %v1269_v13, %v1020_v17  ;;  %v924_v8 = vpop.permute.xlu2 %923  ;;  %v891_v13 = vrot.slane %v4085_v33, 1  ;;  %v1421_v17 = vrot.slane %v4265_v37, 1 }
  0xe3   : > { %v897_v1 = vpop.permute.xlu0 %896  ;;  %v1318_v54 = vsel %vm1156_vm4, %v1298_v31, %v1043_v47  ;;  %v861_v47 = vrot.slane %v4077_v25, 1  ;;  %v4488_v31 = vsel %vm1114_vm2, %v4028_v59, %v4382_v15 }
  0xe4   : > { %1978 = vmatmul.bf16.gmra.mxu3 %v1176_v44  ;;  %1899 = vmatmul.bf16.vlgmr.msra.gmra.mxu2 %v1318_v54  ;;  %v1189_v5 = vsel %vm1114_vm2, %v838_v24, %v897_v1 }
  0xe5   : > { %v4491_v1 = vsel %vm835_vm1, %v860_v0, %v861_v47  ;;  %v4518_v0 = vld [vmem:[%s3843_s13 + $0x78] sm:$0xff] }
  0xe6   : > { %1806 = vmatmul.bf16.gmra.mxu0 %v1173_v48  ;;  %v890_v48 = vrot.slane %v4069_v63, 1 }
  0xe7   : > { %933 = vrot.lane.b32.xlu1 %v4028_v59, %s3762_s16  ;;  %v1151_v59 = vsel %vm1135_vm3, %v4488_v31, %v4404_v38 }
  0xe8   : > { %958 = vrot.lane.b32.xlu2 %v4039_v10, %s3761_s15  ;;  %v1179_v24 = vsel %vm1156_vm4, %v1151_v59, %v4324_v30  ;;  %v863_v30 = vrot.slane %v4100_v60, 1 }
  0xe9   : > { %1373 = vrot.lane.b32.xlu0 %v4085_v33, %s3760_s14  ;;  %v922_v23 = vpop.permute.xlu1 %921 }
  0xea   : > { %v1218_v42 = vsel %vm1135_vm3, %v1189_v5, %v922_v23  ;;  %v4474_v2 = vpop.permute.xlu2 %1000  ;;  %v332_v23 = vld [vmem:[%s3843_s13 + $0x80] sm:$0x1] }
  0xeb   : > { %v1362_v32 = vpop.permute.xlu0 %1361  ;;  %v1238_v20 = vsel %vm1156_vm4, %v1218_v42, %v947_v28  ;;  %v4494_v28 = vsel %vm835_vm1, %v890_v48, %v891_v13  ;;  %v967_v47 = vunpack.c.l.b16 %v332_v23  ;;  %v1424_v23 = vrot.slane %v4299_v29, 1 }
  0xec   : > { %v1382_v10 = vsel %vm1114_vm2, %v3899_v46, %v1362_v32  ;;  %1840 = vmatmul.bf16.vlgmr.msra.gmra.mxu1 %v1238_v20  ;;  %v1275_v29 = vsel %vm1114_vm2, %v3966_v45, %v4474_v2 }
  0xed   : > { %v1422_v33 = vrot.slane %v1382_v10, 1  ;;  %v4529_v48 = vpack.c.b16 %v967_v47, %v967_v47 }
  0xef   : > { %1010 = vrot.lane.b32.xlu1 %v4133_v57, %s3760_s14  ;;  %v4499_v46 = vsel %vm835_vm1, %v1421_v17, %v1422_v33  ;;  %v370_v17 = vld [vmem:[%s3841_s12 + $0x80] sm:$0x1] }
  0xf0   : > { %1033 = vrot.lane.b32.xlu2 %v4491_v1, %s3762_s16 }
  0xf1   : > { %v999_v37 = vpop.permute.xlu1 %998  ;;  %1056 = vrot.lane.b32.xlu0 %v4494_v28, %s3761_s15 }
  0xf2   : > { %v1272_v15 = vsel %vm1114_vm2, %v3938_v21, %v999_v37  ;;  %v4510_v54 = vpop.permute.xlu2 %900  ;;  %v4554_v37 = vld [vmem:[%s3841_s12 + $0x78] sm:$0xff] }
  0xf3   : > { %v1045_v57 = vpop.permute.xlu0 %1044  ;;  %v1300_v5 = vsel %vm1135_vm3, %v1272_v15, %v1022_v26  ;;  %v864_v26 = vrot.slane %v4113_v39, 1  ;;  %v982_v15 = vunpack.c.l.b16 %v370_v17  ;;  %v1195_v17 = vsel %vm1114_vm2, %v4215_v16, %v4510_v54 }
  0xf4   : > { %1983 = vmatmul.bf16.gmra.mxu3 %v1179_v24  ;;  %v1321_v38 = vsel %vm1156_vm4, %v1300_v5, %v1045_v57  ;;  %v894_v57 = vrot.slane %v4118_v36, 1 }
  0xf5   : > { %1904 = vmatmul.bf16.gmra.mxu2 %v1321_v38  ;;  %v4544_v33 = vsel %vm835_vm1, %v863_v30, %v864_v26 }
  0xf6   : > { %1811 = vmatmul.bf16.gmra.mxu0 %v1176_v44 }
  0xf7   : > { %910 = vrot.lane.b32.xlu1 %v889_v6, %s3760_s14  ;;  %v972_v6 = vshll.u32 %v4518_v0, 16 }
  0xf8   : > { %935 = vrot.lane.b32.xlu2 %v4065_v52, %s3762_s16 }
  0xf9   : > { %v899_v21 = vpop.permute.xlu1 %898  ;;  %960 = vrot.lane.b32.xlu0 %v4069_v63, %s3761_s15  ;;  %v1427_v63 = vrot.slane %v4353_v9, 1  ;;  %v974_v59 = vrot.slane %v972_v6, 1 }
  0xfa   : > { %v1192_v44 = vsel %vm1114_vm2, %v4178_v61, %v899_v21  ;;  %v1366_v42 = vpop.permute.xlu2 %1365  ;;  %v4541_v61 = vsel %vm1114_vm2, %v4065_v52, %v4413_v50  ;;  %v893_v50 = vrot.slane %v4107_v19, 1 }
  0xfb   : > { %v1386_v13 = vsel %vm1114_vm2, %v3955_v35, %v1366_v42  ;;  %v949_v32 = vpop.permute.xlu0 %948  ;;  %v1220_v20 = vsel %vm1135_vm3, %v1192_v44, %v924_v8  ;;  %v970_v35 = vshrl.u32 %v4518_v0, 16  ;;  %v977_v8 = vshll.u32 %v4529_v48, 16 }
  0xfc   : > { %v1428_v10 = vrot.slane %v1386_v13, 1  ;;  %v1241_v43 = vsel %vm1156_vm4, %v1220_v20, %v949_v32  ;;  %v1153_v52 = vsel %vm1135_vm3, %v4541_v61, %v4422_v40  ;;  %v4572_v44 = vpack.c.b16 %v982_v15, %v982_v15 }
  0xfd   : > { %1845 = vmatmul.bf16.gmra.mxu1 %v1241_v43  ;;  %v975_v21 = vor.u32 %v974_v59, %v970_v35  ;;  %v979_v40 = vrot.slane %v977_v8, 1  ;;  %v985_v13 = vshrl.u32 %v4554_v37, 16  ;;  %v4605_v35 = vsel %vm1114_vm2, %v4100_v60, %v4426_v58  ;;  %v335_v58 = vld [vmem:[%s3843_s13 + $0x8c] sm:$0x1] }
  0xfe   : > { %v4549_v9 = vsel %vm835_vm1, %v1427_v63, %v1428_v10  ;;  %v992_v45 = vshll.u32 %v4572_v44, 16  ;;  %v1155_v15 = vsel %vm1135_vm3, %v4605_v35, %v4436_v53  ;;  %v373_v53 = vld [vmem:[%s3841_s12 + $0x8c] sm:$0x1] }
  0xff   : > { %1375 = vrot.lane.b32.xlu1 %v4118_v36, %s3760_s14  ;;  %v1182_v36 = vsel %vm1156_vm4, %v1153_v52, %v4349_v18  ;;  %v4585_v6 = vsel %vm524_vm0, %v975_v21, %v979_v40  ;;  %v5466_v21 = vld [vmem:[#allocation2_spill] sm:$0xff] }
 0x100   : > { %1012 = vrot.lane.b32.xlu2 %v4156_v49, %s3760_s14  ;;  %v987_v49 = vshll.u32 %v4554_v37, 16  ;;  %v994_v43 = vrot.slane %v992_v45, 1 }
 0x101   : > { %v1364_v5 = vpop.permute.xlu1 %1363  ;;  %1035 = vrot.lane.b32.xlu0 %v4544_v33, %s3762_s16 }
 0x102   : > { %v1384_v38 = vsel %vm1114_vm2, %v3923_v4, %v1364_v5  ;;  %v4568_v47 = vpop.permute.xlu2 %1048  ;;  %v4579_v4 = vsel %vm835_vm1, %v893_v50, %v894_v57  ;;  %v989_v32 = vrot.slane %v987_v49, 1  ;;  %v1185_v57 = vsel %vm1156_vm4, %v1155_v15, %v4378_v55  ;;  %v4627_v5 = vld [vmem:[%s3843_s13 + $0x84] sm:$0xff] }
 0x103   : > { %v1425_v30 = vrot.slane %v1384_v38, 1  ;;  %v1024_v26 = vpop.permute.xlu0 %1023  ;;  %v3571_v38 = vld [vmem:[%s3841_s12 + $0x84] sm:$0xff]  ;;  %v1082_v55 = vshll.u32 %v4627_v5, 16  ;;  %s3209_s12 = sshll.u32 %s3742_s21, 3 }
 0x104   : > { %1988 = vmatmul.bf16.gmra.mxu3 %v1182_v36  ;;  %v1302_v18 = vsel %vm1135_vm3, %v1275_v29, %v1024_v26  ;;  %v990_v10 = vor.u32 %v989_v32, %v985_v13  ;;  %v1017_v26 = vrot.slane %v4529_v48, 1  ;;  %v1039_v29 = vrot.slane %v4554_v37, 1  ;;  %s4815_s13 = sadd.s32 4294967295, %s3209_s12 }
 0x105   : > { %v4582_v42 = vsel %vm835_vm1, %v1424_v23, %v1425_v30  ;;  %v1077_v23 = vunpack.c.l.b16 %v335_v58  ;;  %v1016_v30 = vrot.slane %v4518_v0, 1  ;;  %v1101_v32 = vshll.u32 %v3571_v38, 16 }
 0x106   : > { %1816 = vmatmul.bf16.gmra.mxu0 %v1179_v24  ;;  %v995_v8 = vsel %vm524_vm0, %v990_v10, %v994_v43  ;;  %v1080_v43 = vshrl.u32 %v4627_v5, 16 }
 0x107   : > { %1058 = vrot.lane.b32.xlu1 %v4579_v4, %s3761_s15  ;;  %v4636_v49 = vpack.c.b16 %v1077_v23, %v1077_v23  ;;  %v1018_v10 = vsel %vm835_vm1, %v1016_v30, %v1017_v26  ;;  %v1103_v15 = vrot.slane %v1101_v32, 1 }
 0x108   : > { %1072 = vrot.lane.b32.xlu2 %v4554_v37, %s3760_s14 }
 0x109   : > { %v1047_v2 = vpop.permute.xlu1 %1046  ;;  %1091 = vrot.lane.b32.xlu0 %v4585_v6, %s3762_s16 }
 0x10a   : > { %v4596_v24 = vpop.permute.xlu2 %952  ;;  %v1324_v20 = vsel %vm1156_vm4, %v1302_v18, %v1047_v2  ;;  %v1040_v18 = vrot.slane %v4572_v44, 1 }
 0x10b   : > { %v926_v63 = vpop.permute.xlu0 %925  ;;  %1909 = vmatmul.bf16.gmra.mxu2 %v1324_v20 }
 0x10c   : > { %v1222_v59 = vsel %vm1135_vm3, %v1195_v17, %v926_v63  ;;  %v1084_v17 = vrot.slane %v1082_v55, 1 }
 0x10f   : > { %912 = vrot.lane.b32.xlu1 %v4494_v28, %s3760_s14 }
 0x110   : > { %1110 = vrot.lane.b32.xlu2 %v995_v8, %s3761_s15 }
 0x111   : > { %v951_v16 = vpop.permute.xlu1 %950  ;;  %937 = vrot.lane.b32.xlu0 %v4100_v60, %s3762_s16  ;;  %v1096_v60 = vunpack.c.l.b16 %v373_v53 }
 0x112   : > { %v4618_v54 = vpop.permute.xlu2 %1027  ;;  %v1244_v52 = vsel %vm1156_vm4, %v1222_v59, %v951_v16  ;;  %v1087_v59 = vshll.u32 %v4636_v49, 16 }
 0x113   : > { %v4621_v50 = vpop.f32.mrf.mxu0  ;;  %v1003_v28 = vpop.permute.xlu0 %1002  ;;  %1850 = vmatmul.bf16.gmra.mxu1 %v1244_v52  ;;  %v1097_v45 = vpack.c.b16 %v1096_v60, %v1096_v60  ;;  %v1085_v52 = vor.u32 %v1084_v17, %v1080_v43 }
 0x114   : > { %1993 = vmatmul.bf16.gmra.mxu3 %v1185_v57  ;;  %v1278_v40 = vsel %vm1114_vm2, %v5466_v21, %v1003_v28 }
 0x115   : > { %v1106_v16 = vshll.u32 %v1097_v45, 16 }
 0x116   : > { %1821 = vmatmul.bf16.gmra.mxu0 %v1182_v36 }
 0x117   : > { %962 = vrot.lane.b32.xlu1 %v4107_v19, %s3761_s15  ;;  %v1108_v21 = vrot.slane %v1106_v16, 1 }
 0x118   : > { %1377 = vrot.lane.b32.xlu2 %v4572_v44, %s3760_s14  ;;  %v1041_v44 = vsel %vm835_vm1, %v1039_v29, %v1040_v18 }
 0x119   : > { %v1026_v36 = vpop.permute.xlu1 %1025  ;;  %1014 = vrot.lane.b32.xlu0 %v995_v8, %s3760_s14  ;;  %v1099_v8 = vshrl.u32 %v3571_v38, 16 }
 0x11a   : > { %v1304_v19 = vsel %vm1135_vm3, %v1278_v40, %v1026_v36  ;;  %v930_v13 = vpop.permute.xlu2 %929  ;;  %v5467_v36 = vld [vmem:[#allocation3_spill] sm:$0xff] }
 0x11b   : > { %v4645_v2 = vpop.f32.mrf.mxu0  ;;  %v903_v20 = vpop.permute.xlu0 %902  ;;  %v1327_v63 = vsel %vm1156_vm4, %v1304_v19, %v4568_v47  ;;  %v1089_v47 = vrot.slane %v1087_v59, 1  ;;  %v1104_v60 = vor.u32 %v1103_v15, %v1099_v8 }
 0x11c   : > { %1914 = vmatmul.bf16.gmra.mxu2 %v1327_v63  ;;  %v1198_v58 = vsel %vm1114_vm2, %v4237_v56, %v903_v20 }
 0x11d   : > { %v1090_v26 = vsel %vm524_vm0, %v1085_v52, %v1089_v47  ;;  %v1109_v55 = vsel %vm524_vm0, %v1104_v60, %v1108_v21 }
 0x11f   : > { %1037 = vrot.lane.b32.xlu1 %v1018_v10, %s3762_s16 }
 0x120   : > { %1060 = vrot.lane.b32.xlu2 %v1041_v44, %s3761_s15  ;;  %v5468_v44 = vld [vmem:[#allocation4_spill] sm:$0xff] }
 0x121   : > { %v928_v28 = vpop.permute.xlu1 %927  ;;  %1074 = vrot.lane.b32.xlu0 %v3571_v38, %s3760_s14 }
 0x122   : > { %v1224_v53 = vsel %vm1135_vm3, %v1198_v58, %v928_v28  ;;  %v1007_v23 = vpop.permute.xlu2 %1006 }
 0x123   : > { %v4659_v40 = vpop.f32.mrf.mxu0  ;;  %v4661_v30 = vpop.permute.xlu0 %1367  ;;  %v1247_v56 = vsel %vm1156_vm4, %v1224_v53, %v4596_v24 }
 0x124   : > { %1855 = vmatmul.bf16.gmra.mxu1 %v1247_v56  ;;  %v5469_v56 = vld [vmem:[#allocation5_spill] sm:$0xff] }
 0x126   : > { %1826 = vmatmul.bf16.gmra.mxu0 %v1185_v57 }
 0x127   : > { %1093 = vrot.lane.b32.xlu1 %v1090_v26, %s3762_s16 }
 0x128   : > { %914 = vrot.lane.b32.xlu2 %v4579_v4, %s3760_s14 }
 0x129   : > { %v1005_v38 = vpop.permute.xlu1 %1004  ;;  %1112 = vrot.lane.b32.xlu0 %v1109_v55, %s3761_s15 }
 0x12a   : > { %v1281_v29 = vsel %vm1114_vm2, %v5467_v36, %v1005_v38  ;;  %v907_v18 = vpop.permute.xlu2 %906 }
 0x12b   : > { %v4673_v19 = vpop.f32.mrf.mxu0  ;;  %v1051_v24 = vpop.permute.xlu0 %1050  ;;  %v1306_v57 = vsel %vm1135_vm3, %v1281_v29, %v4618_v54 }
 0x12c   : > { %v1330_v32 = vsel %vm1156_vm4, %v1306_v57, %v1051_v24 }
 0x12d   : > { %1919 = vmatmul.bf16.gmra.mxu2 %v1330_v32 }
 0x12f   : > { %939 = vrot.lane.b32.xlu1 %v4518_v0, %s3762_s16 }
 0x130   : > { %964 = vrot.lane.b32.xlu2 %v4554_v37, %s3761_s15 }
 0x131   : > { %v905_v4 = vpop.permute.xlu1 %904  ;;  %1379 = vrot.lane.b32.xlu0 %v1097_v45, %s3760_s14 }
 0x132   : > { %v1201_v20 = vsel %vm1114_vm2, %v4284_v11, %v905_v4  ;;  %v4688_v43 = vpop.permute.xlu2 %1371  ;;  %v1284_v11 = vsel %vm1114_vm2, %v5468_v44, %v1007_v23 }
 0x133   : > { %v4685_v63 = vpop.f32.mrf.mxu0  ;;  %v955_v10 = vpop.permute.xlu0 %954  ;;  %v1226_v54 = vsel %vm1135_vm3, %v1201_v20, %v930_v13 }
 0x134   : > { %v1250_v17 = vsel %vm1156_vm4, %v1226_v54, %v955_v10  ;;  %v1388_v54 = vsel %vm1114_vm2, %v3986_v3, %v4661_v30 }
 0x135   : > { %1860 = vmatmul.bf16.gmra.mxu1 %v1250_v17  ;;  %v1431_v17 = vrot.slane %v1388_v54, 1 }
 0x136   : > { %3453 = vmatmul.msk.bf16.vlgmr.msrb.gmra.mxu0 %vm1135_vm3, %v4499_v46  ;;  %v1204_v46 = vsel %vm1114_vm2, %v4329_v62, %v907_v18 }
 0x139   : > { %v1370_v37 = vpop.permute.xlu1 %1369 }
 0x13a   : > { %v1055_v8 = vpop.permute.xlu2 %1054 }
 0x13b   : > { %v4693_v59 = vpop.f32.mrf.mxu0  ;;  %v1030_v45 = vpop.permute.xlu0 %1029 }
 0x13c   : > { %v1308_v15 = vsel %vm1135_vm3, %v1284_v11, %v1030_v45  ;;  %v1430_v45 = vrot.slane %v4411_v12, 1 }
 0x141   : > { %v1053_v16 = vpop.permute.xlu1 %1052 }
 0x142   : > { %v1333_v13 = vsel %vm1156_vm4, %v1308_v15, %v1053_v16  ;;  %v959_v47 = vpop.permute.xlu2 %958 }
 0x143   : > { %v4699_v58 = vpop.f32.mrf.mxu0  ;;  %v932_v52 = vpop.permute.xlu0 %931  ;;  %1924 = vmatmul.bf16.gmra.mxu2 %v1333_v13  ;;  %v1432_v13 = vsel %vm835_vm1, %v1430_v45, %v1431_v17 }
 0x144   : > { %v1228_v28 = vsel %vm1135_vm3, %v1204_v46, %v932_v52 }
 0x146   : > { %3454 = vmatmul.msk.bf16.gmra.mxu0 %vm1135_vm3, %v4582_v42 }
 0x149   : > { %v957_v53 = vpop.permute.xlu1 %956 }
 0x14a   : > { %v1253_v23 = vsel %vm1156_vm4, %v1228_v28, %v957_v53  ;;  %v1034_v55 = vpop.permute.xlu2 %1033 }
 0x14b   : > { %v4707_v60 = vpop.f32.mrf.mxu0  ;;  %v1009_v21 = vpop.permute.xlu0 %1008  ;;  %1865 = vmatmul.bf16.gmra.mxu1 %v1253_v23 }
 0x14c   : > { %v1287_v26 = vsel %vm1114_vm2, %v5469_v56, %v1009_v21  ;;  %v1433_v21 = vrot.slane %v4446_v34, 1 }
 0x151   : > { %v1032_v38 = vpop.permute.xlu1 %1031 }
 0x152   : > { %v1310_v62 = vsel %vm1135_vm3, %v1287_v26, %v1032_v38  ;;  %v936_v32 = vpop.permute.xlu2 %935 }
 0x153   : > { %v4712_v36 = vpop.f32.mrf.mxu0  ;;  %v909_v42 = vpop.permute.xlu0 %908  ;;  %v1336_v29 = vsel %vm1156_vm4, %v1310_v62, %v1055_v8 }
 0x154   : > { %1929 = vmatmul.bf16.gmra.mxu2 %v1336_v29  ;;  %v1207_v18 = vsel %vm1114_vm2, %v4391_v27, %v909_v42 }
 0x156   : > { %3455 = vmatmul.msk.bf16.gmra.mxu0 %vm1135_vm3, %v4549_v9 }
 0x159   : > { %v934_v24 = vpop.permute.xlu1 %933 }
 0x15a   : > { %v1230_v57 = vsel %vm1135_vm3, %v1207_v18, %v934_v24  ;;  %v1013_v16 = vpop.permute.xlu2 %1012  ;;  %v1392_v24 = vsel %vm1114_vm2, %v4043_v14, %v4688_v43 }
 0x15b   : > { %v4720_v4 = vpop.f32.mrf.mxu0  ;;  %v4722_v20 = vpop.permute.xlu0 %1373  ;;  %v1256_v10 = vsel %vm1156_vm4, %v1230_v57, %v959_v47  ;;  %v1390_v47 = vsel %vm1114_vm2, %v4016_v41, %v1370_v37  ;;  %v1293_v26 = vsel %vm1114_vm2, %v4153_v51, %v1013_v16  ;;  %v1437_v57 = vrot.slane %v1392_v24, 1 }
 0x15c   : > { %1870 = vmatmul.bf16.gmra.mxu1 %v1256_v10  ;;  %v1434_v53 = vrot.slane %v1390_v47, 1  ;;  %v1436_v10 = vrot.slane %v4488_v31, 1  ;;  %v1439_v47 = vrot.slane %v4541_v61, 1  ;;  %v2088_v24 = vlaneseq }
 0x161   : > { %v1011_v9 = vpop.permute.xlu1 %1010 }
 0x162   : > { %v1290_v27 = vsel %vm1114_vm2, %v4128_v7, %v1011_v9  ;;  %v1073_v28 = vpop.permute.xlu2 %1072 }
 0x163   : > { %v1312_v44 = vsel %vm1135_vm3, %v1290_v27, %v1034_v55  ;;  %v4732_v11 = vpop.f32.mrf.mxu0  ;;  %v1057_v8 = vpop.permute.xlu0 %1056  ;;  %v1435_v55 = vsel %vm835_vm1, %v1433_v21, %v1434_v53  ;;  %v4757_v37 = vsel %vm1114_vm2, %v4518_v0, %v1073_v28  ;;  %v1438_v27 = vsel %vm835_vm1, %v1436_v10, %v1437_v57 }
 0x164   : > { %v1339_v15 = vsel %vm1156_vm4, %v1312_v44, %v1057_v8 }
 0x165   : > { %1934 = vmatmul.bf16.gmra.mxu2 %v1339_v15  ;;  %v4781_v15 = vpop.f32.mrf.mxu3 }
 0x166   : > { %3456 = vmatmul.msk.bf16.gmra.mxu0 %vm1135_vm3, %v1432_v13 }
 0x167   : > { %v1900_v13 = vpop.f32.mrf.mxu2 }
 0x169   : > { %v911_v3 = vpop.permute.xlu1 %910  ;;  %v1841_v14 = vpop.f32.mrf.mxu1 }
 0x16a   : > { %v1210_v30 = vsel %vm1114_vm2, %v4441_v22, %v911_v3  ;;  %v1111_v62 = vpop.permute.xlu2 %1110 }
 0x16b   : > { %v1232_v7 = vsel %vm1135_vm3, %v1210_v30, %v936_v32  ;;  %v4740_v12 = vpop.f32.mrf.mxu0  ;;  %v961_v52 = vpop.permute.xlu0 %960 }
 0x16c   : > { %v1259_v46 = vsel %vm1156_vm4, %v1232_v7, %v961_v52 }
 0x16d   : > { %1875 = vmatmul.bf16.gmra.mxu1 %v1259_v46 }
 0x171   : > { %v4745_v23 = vpop.permute.xlu1 %1375  ;;  %v1843_v52 = vpop.f32.mrf.mxu1 }
 0x172   : > { %v4768_v0 = vpop.permute.xlu2 %1377 }
 0x173   : > { %v4748_v56 = vpop.f32.mrf.mxu0  ;;  %v1036_v22 = vpop.permute.xlu0 %1035 }
 0x174   : > { %v1314_v38 = vsel %vm1135_vm3, %v1293_v26, %v1036_v22 }
 0x176   : > { %3457 = vmatmul.msk.bf16.gmra.mxu0 %vm1135_vm3, %v1435_v55 }
 0x179   : > { %v1059_v41 = vpop.permute.xlu1 %1058 }
 0x17a   : > { %v1342_v34 = vsel %vm1156_vm4, %v1314_v38, %v1059_v41  ;;  %v1061_v16 = vpop.permute.xlu2 %1060 }
 0x17b   : > { %v4760_v42 = vpop.f32.mrf.mxu0  ;;  %v1092_v29 = vpop.permute.xlu0 %1091  ;;  %1939 = vmatmul.bf16.gmra.mxu2 %v1342_v34 }
 0x17c   : > { %v1352_v51 = vsel %vm1135_vm3, %v4757_v37, %v1092_v29  ;;  %v1846_v34 = vpop.f32.mrf.mxu1  ;;  %v1396_v29 = vsel %vm1114_vm2, %v4113_v39, %v4745_v23  ;;  %v4824_v23 = vld [vmem:[%s5454_s3] ss:$0 sm:$0xff] }
 0x17d   : > { %v1356_v18 = vsel %vm1156_vm4, %v1352_v51, %v1111_v62  ;;  %v1443_v57 = vrot.slane %v1396_v29, 1 }
 0x17e   : > { %1998 = vmatmul.bf16.gmra.mxu3 %v1356_v18 }
 0x181   : > { %v913_v32 = vpop.permute.xlu1 %912 }
 0x182   : > { %v1213_v9 = vsel %vm1114_vm2, %v4491_v1, %v913_v32  ;;  %v1394_v1 = vsel %vm1114_vm2, %v4077_v25, %v4722_v20  ;;  %v4794_v25 = vpop.f32.mrf.mxu3  ;;  %v1902_v20 = vpop.f32.mrf.mxu2 }
 0x183   : > { %v4771_v54 = vpop.f32.mrf.mxu0  ;;  %v938_v17 = vpop.permute.xlu0 %937  ;;  %v1440_v30 = vrot.slane %v1394_v1, 1 }
 0x184   : > { %v1234_v45 = vsel %vm1135_vm3, %v1213_v9, %v938_v17  ;;  %v1442_v9 = vrot.slane %v4605_v35, 1  ;;  %v1783_v35 = vadd.f32 %v4824_v23, %v4621_v50  ;;  %v1785_v50 = vadd.f32 %v4824_v23, %v4645_v2 }
 0x185   : > { %v1441_v22 = vsel %vm835_vm1, %v1439_v47, %v1440_v30 }
 0x186   : > { %3458 = vmatmul.msk.bf16.gmra.mxu0 %vm1135_vm3, %v1438_v27  ;;  %v4826_v27 = vshrl.u32 %v2088_v24, 7  ;;  %v1842_v1 = vadd.f32 %v1841_v14, %v1783_v35 }
 0x189   : > { %v963_v43 = vpop.permute.xlu1 %962 }
 0x18a   : > { %v1262_v44 = vsel %vm1156_vm4, %v1234_v45, %v963_v43  ;;  %v1905_v32 = vpop.f32.mrf.mxu2  ;;  %v1444_v45 = vsel %vm835_vm1, %v1442_v9, %v1443_v57  ;;  %v2092_v43 = vstv %s4815_s13  ;;  %v3625_v9 = vld [vmem:[%s5455_s4 + $0x88] sm:$0xff] }
 0x18b   : > { %v4779_v8 = vpop.f32.mrf.mxu0  ;;  %1880 = vmatmul.bf16.gmra.mxu1 %v1262_v44  ;;  %v1015_v31 = vpop.permute.xlu0 %1014  ;;  %3008 = vmatpush.bf16.msrb.mxu3 %v3625_v9 }
 0x18c   : > { %v1296_v3 = vsel %vm1114_vm2, %v4585_v6, %v1015_v31  ;;  %v915_v6 = vpop.permute.xlu2 %914  ;;  %v1848_v44 = vpop.f32.mrf.mxu1  ;;  %v2093_v31 = vadd.s32 %v2092_v43, %v4826_v27 }
 0x18d   : > { %v1216_v51 = vsel %vm1114_vm2, %v4544_v33, %v915_v6  ;;  %v3763_v6 = vmov 0  }
 0x18e   : > { %vm2095_vm5 = vcmp.ge.s32.totalorder %v2093_v31, 0  ;;  %vm2097_vm6 = vcmp.lt.s32.totalorder %v2093_v31, 16 }
 0x18f   : > { %vm2099_vm7 = vmand %vm2095_vm5, %vm2097_vm6 }
 0x191   : > { %v1038_v7 = vpop.permute.xlu1 %1037 }
 0x192   : > { %v1316_v46 = vsel %vm1135_vm3, %v1296_v3, %v1038_v7  ;;  %v1907_v3 = vpop.f32.mrf.mxu2  ;;  %v1901_v7 = vadd.f32 %v1900_v13, %v1842_v1  ;;  %v1790_v1 = vadd.f32 %v4824_v23, %v4673_v19 }
 0x193   : > { %v4790_v28 = vpop.f32.mrf.mxu0  ;;  %v1075_v53 = vpop.permute.xlu0 %1074  ;;  %v1345_v21 = vsel %vm1156_vm4, %v1316_v46, %v1061_v16  ;;  %v1398_v46 = vsel %vm1114_vm2, %v4529_v48, %v4768_v0 }
 0x194   : > { %1944 = vmatmul.bf16.gmra.mxu2 %v1345_v21  ;;  %v4799_v26 = vsel %vm1114_vm2, %v4627_v5, %v1075_v53  ;;  %v4812_v5 = vpop.f32.mrf.mxu3  ;;  %v965_v18 = vpop.permute.xlu2 %964  ;;  %v1445_v53 = vrot.slane %v4757_v37, 1  ;;  %v1446_v21 = vrot.slane %v1398_v46, 1  ;;  %v1960_v14 = vadd.f32 %v4781_v15, %v1901_v7 }
 0x195   : > { %v1851_v47 = vpop.f32.mrf.mxu1  ;;  %v1788_v37 = vadd.f32 %v4824_v23, %v4659_v40  ;;  %v3623_v40 = vld [vmem:[%s5455_s4 + $0x78] sm:$0xff]  ;;  %v1448_v46 = vrot.slane %v4799_v26, 1 }
 0x196   : > { %3459 = vmatmul.msk.bf16.gmra.mxu0 %vm1135_vm3, %v1441_v22  ;;  %v1844_v22 = vadd.f32 %v1843_v52, %v1785_v50  ;;  %v1447_v2 = vsel %vm835_vm1, %v1445_v53, %v1446_v21  ;;  %2953 = vmatpush.bf16.msrb.mxu2 %v3623_v40  ;;  %v1849_v21 = vadd.f32 %v1848_v44, %v1790_v1 }
 0x199   : > { %v1094_v61 = vpop.permute.xlu1 %1093 }
 0x19a   : > { %v1354_v55 = vsel %vm1135_vm3, %v4799_v26, %v1094_v61  ;;  %v4848_v61 = vsel %vm2099_vm7, 1, %v3763_v6  ;;  %v4850_v13 = vpop.f32.mrf.mxu2  ;;  %v1793_v26 = vadd.f32 %v4824_v23, %v4685_v63 }
 0x19b   : > { %v4803_v38 = vpop.f32.mrf.mxu0  ;;  %v1113_v62 = vpop.permute.xlu0 %1112  ;;  %v2103_v0 = vperm.slane %v4848_v61, 0 }
 0x19c   : > { %v1359_v41 = vsel %vm1156_vm4, %v1354_v55, %v1113_v62  ;;  %v4836_v16 = vpop.f32.mrf.mxu3  ;;  %v1852_v29 = vadd.f32 %v1851_v47, %v1793_v26 }
 0x19d   : > { %2003 = vmatmul.bf16.gmra.mxu3 %v1359_v41  ;;  %v1903_v41 = vadd.f32 %v1902_v20, %v1844_v22  ;;  %v4859_v52 = vpop.f32.mrf.mxu1  ;;  %vm4861_vm8 = vcmp.ne.s32.totalorder %v2103_v0, 0 }
 0x1a1   : > { %v940_v10 = vpop.permute.xlu1 %939 }
 0x1a2   : > { %v1236_v17 = vsel %vm1135_vm3, %v1216_v51, %v940_v10  ;;  %v1847_v51 = vadd.f32 %v1846_v34, %v1788_v37 }
 0x1a3   : > { %v4818_v39 = vpop.f32.mrf.mxu0  ;;  %v1265_v33 = vsel %vm1156_vm4, %v1236_v17, %v965_v18  ;;  %v1962_v18 = vadd.f32 %v4794_v25, %v1903_v41  ;;  %v1380_v24 = vpop.permute.xlu0 %1379  ;;  %v3615_v25 = vld [vmem:[%s5455_s4 + $0x38] sm:$0xff]  ;;  %v1908_v41 = vadd.f32 %v1907_v3, %v1849_v21  ;;  %v3622_v3 = vld [vmem:[%s5455_s4 + $0x70] sm:$0xff] }
 0x1a4   : > { %1885 = vmatmul.bf16.gmra.mxu1 %v1265_v33  ;;  %v4852_v62 = vpop.f32.mrf.mxu3  ;;  %v4868_v17 = vpop.f32.mrf.mxu2  ;;  %v1906_v33 = vadd.f32 %v1905_v32, %v1847_v51  ;;  %2954 = vmatpush.bf16.msrb.mxu2 %v3622_v3  ;;  %v3621_v3 = vld [vmem:[%s5455_s4 + $0x68] sm:$0xff] }
 0x1a5   : > { %2904 = vmatpush.bf16.msrb.mxu1 %v3615_v25  ;;  %v1856_v22 = vpop.f32.mrf.mxu1  ;;  %v1967_v51 = vadd.f32 %v4836_v16, %v1908_v41  ;;  %v1795_v25 = vadd.f32 %v4824_v23, %v4693_v59 }
 0x1a6   : > { %3460 = vmatmul.msk.bf16.gmra.mxu0 %vm1135_vm3, %v1444_v45  ;;  %v1400_v45 = vsel %vm1114_vm2, %v4636_v49, %v1380_v24  ;;  %v1965_v32 = vadd.f32 %v4812_v5, %v1906_v33  ;;  %v3614_v24 = vld [vmem:[%s5455_s4 + $0x30] sm:$0xff] }
 0x1a7   : > { %v1449_v50 = vrot.slane %v1400_v45, 1 }
 0x1a8   : > { %2955 = vmatpush.bf16.msrb.mxu2 %v3621_v3 }
 0x1a9   : > { %v1450_v19 = vsel %vm835_vm1, %v1448_v46, %v1449_v50  ;;  %2905 = vmatpush.bf16.msrb.mxu1 %v3614_v24  ;;  %v3613_v24 = vld [vmem:[%s5455_s4 + $0x28] sm:$0xff] }
 0x1ab   : > { %v4838_v30 = vpop.f32.mrf.mxu0 }
 0x1ac   : > { %v4879_v34 = vpop.f32.mrf.mxu3  ;;  %v4892_v37 = vpop.f32.mrf.mxu2 }
 0x1ad   : > { %v4914_v47 = vpop.f32.mrf.mxu1  ;;  %2906 = vmatpush.bf16.msrb.mxu1 %v3613_v24 }
 0x1b3   : > { %v2018_v55 = vpop.f32.mrf.mxu0 }
 0x1b4   : > { %v2019_v48 = vadd.f32 %v2018_v55, %v1960_v14  ;;  %v4896_v44 = vpop.f32.mrf.mxu3  ;;  %v4921_v45 = vpop.f32.mrf.mxu2 }
 0x1b6   : > { %3461 = vmatmul.msk.bf16.gmra.mxu0 %vm1135_vm3, %v1447_v2  ;;  %v2068_v15 = vmax.f32 %v2019_v48, 0.0  ;;  %v2104_v2 = vperm.slane %v4848_v61, 1 }
 0x1b8   : > { %v2143_v20 = vsel %vm4861_vm8, %v2068_v15, 0.0  ;;  %vm4898_vm9 = vcmp.ne.s32.totalorder %v2104_v2, 0 }
 0x1b9   : > { %v2163_v31 = vpack.c.bf16 %v2143_v20, %v2143_v20  ;;  %v3624_v20 = vld [vmem:[%s5455_s4 + $0x80] sm:$0xff] }
 0x1ba   : > { %3009 = vmatpush.bf16.msrb.mxu3 %v3624_v20 }
 0x1bb   : > { %v2020_v57 = vpop.f32.mrf.mxu0  ;;  %v2203_v49 = vunpack.c.l.b16 %v2163_v31 }
 0x1bc   : > { %v2021_v10 = vadd.f32 %v2020_v57, %v1962_v18  ;;  %v4923_v1 = vpop.f32.mrf.mxu3 }
 0x1be   : > { %v2069_v35 = vmax.f32 %v2021_v10, 0.0  ;;  %v1911_v10 = vadd.f32 %v4850_v13, %v1852_v29  ;;  %v1920_v29 = vpop.f32.mrf.mxu2 }
 0x1c0   : > { %v2144_v7 = vsel %vm4861_vm8, %v2069_v35, 0.0  ;;  %v1970_v46 = vadd.f32 %v4852_v62, %v1911_v10 }
 0x1c1   : > { %v2164_v53 = vpack.c.bf16 %v2144_v7, %v2144_v7  ;;  %v1854_v7 = vadd.f32 %v4859_v52, %v1795_v25  ;;  %v1798_v52 = vadd.f32 %v4824_v23, %v4699_v58 }
 0x1c3   : > { %v2204_v14 = vunpack.c.l.b16 %v2164_v53  ;;  %v2023_v55 = vpop.f32.mrf.mxu0 }
 0x1c4   : > { %v2024_v48 = vadd.f32 %v2023_v55, %v1965_v32  ;;  %v1913_v55 = vadd.f32 %v4868_v17, %v1854_v7  ;;  %v1857_v17 = vadd.f32 %v1856_v22, %v1798_v52 }
 0x1c5   : > { %v2223_v0 = vpack.c.b16 %v2204_v14, %v2203_v49  ;;  %v2105_v14 = vperm.slane %v4848_v61, 2 }
 0x1c6   : > { %3462 = vmatmul.msk.bf16.gmra.mxu0 %vm1135_vm3, %v1450_v19  ;;  %v2070_v5 = vmax.f32 %v2024_v48, 0.0  ;;  %v1861_v48 = vpop.f32.mrf.mxu1  ;;  %v1972_v15 = vadd.f32 %v4879_v34, %v1913_v55 }
 0x1c7   : > { %v2234_v16 = vshrl.u32 %v2223_v0, 16  ;;  %v2237_v13 = vshll.u32 %v2223_v0, 16  ;;  %vm4939_vm13 = vcmp.ne.s32.totalorder %v2105_v14, 0 }
 0x1c8   : > { %v2145_v63 = vsel %vm4898_vm9, %v2070_v5, 0.0 }
 0x1c9   : > { %v2165_v9 = vpack.c.bf16 %v2145_v63, %v2145_v63  ;;  %v2236_v35 = vrot.slane %v2234_v16, 7  ;;  %v4954_v63 = vpop.f32.mrf.mxu3  ;;  %v1916_v16 = vadd.f32 %v4892_v37, %v1857_v17 }
 0x1cb   : > { %v2025_v18 = vpop.f32.mrf.mxu0  ;;  %v2205_v50 = vunpack.c.l.b16 %v2165_v9  ;;  %v2239_v59 = vor.u32 %v2237_v13, %v2236_v35 }
 0x1cc   : > { %v2026_v57 = vadd.f32 %v2025_v18, %v1967_v51 }
 0x1cd   : > { %v4937_v19 = vsel %vm4931_vm12, 0, %v2239_v59 }
 0x1ce   : > { %v2071_v40 = vmax.f32 %v2026_v57, 0.0  ;;  %v2349_v57 = vshll.u32 %v4937_v19, 16  ;;  %v1863_v13 = vpop.f32.mrf.mxu1 }
 0x1d0   : > { %v2146_v33 = vsel %vm4898_vm9, %v2071_v40, 0.0  ;;  %v2351_v37 = vrot.slane %v2349_v57, 1 }
 0x1d1   : > { %v2166_v31 = vpack.c.bf16 %v2146_v33, %v2146_v33  ;;  %v4968_v33 = vsel %vm4931_vm12, %v2236_v35, 0  ;;  %v1975_v35 = vadd.f32 %v4896_v44, %v1916_v16  ;;  %v1803_v44 = vadd.f32 %v4824_v23, %v4712_v36 }
 0x1d3   : > { %v2206_v53 = vunpack.c.l.b16 %v2166_v31  ;;  %v2028_v21 = vpop.f32.mrf.mxu0  ;;  %v1800_v31 = vadd.f32 %v4824_v23, %v4707_v60  ;;  %v2354_v60 = vshll.u32 %v4968_v33, 16 }
 0x1d4   : > { %v2029_v32 = vadd.f32 %v2028_v21, %v1970_v46  ;;  %v2347_v21 = vshrl.u32 %v4937_v19, 16 }
 0x1d5   : > { %v2224_v49 = vpack.c.b16 %v2206_v53, %v2205_v50  ;;  %v1859_v53 = vadd.f32 %v4914_v47, %v1800_v31 }
 0x1d6   : > { %v2072_v0 = vmax.f32 %v2029_v32, 0.0  ;;  %v2352_v55 = vor.u32 %v2351_v37, %v2347_v21 }
 0x1d7   : > { %v2241_v2 = vshrl.u32 %v2224_v49, 16  ;;  %v2244_v26 = vshll.u32 %v2224_v49, 16  ;;  %v1918_v47 = vadd.f32 %v4921_v45, %v1859_v53 }
 0x1d8   : > { %v2147_v34 = vsel %vm4939_vm13, %v2072_v0, 0.0  ;;  %v2106_v0 = vperm.slane %v4848_v61, 3 }
 0x1d9   : > { %v2243_v41 = vrot.slane %v2241_v2, 7  ;;  %v2167_v25 = vpack.c.bf16 %v2147_v34, %v2147_v34  ;;  %v4983_v2 = vpop.f32.mrf.mxu2  ;;  %v1977_v45 = vadd.f32 %v4923_v1, %v1918_v47 }
 0x1da   : > { %vm4992_vm14 = vcmp.ne.s32.totalorder %v2106_v0, 0  ;;  %v2474_v0 = vrot.slane %v4937_v19, 1 }
 0x1db   : > { %v2246_v58 = vor.u32 %v2244_v26, %v2243_v41  ;;  %v2030_v51 = vpop.f32.mrf.mxu0  ;;  %v4946_v18 = vsel %vm4931_vm12, %v2243_v41, 0  ;;  %v2207_v32 = vunpack.c.l.b16 %v2167_v25  ;;  %v4986_v41 = vpop.f32.mrf.mxu3  ;;  %v2356_v26 = vrot.slane %v2354_v60, 1 }
 0x1dc   : > { %v2031_v22 = vadd.f32 %v2030_v51, %v1972_v15  ;;  %v2478_v9 = vrot.slane %v4946_v18, 1  ;;  %v1866_v51 = vpop.f32.mrf.mxu1 }
 0x1dd   : > { %v4961_v20 = vsel %vm4931_vm12, 0, %v2246_v58  ;;  %v2357_v15 = vsel %vm524_vm0, %v2352_v55, %v2356_v26  ;;  %v1862_v58 = vadd.f32 %v1861_v48, %v1803_v44  ;;  %v3620_v48 = vld [vmem:[%s5455_s4 + $0x60] sm:$0xff] }
 0x1de   : > { %v2073_v10 = vmax.f32 %v2031_v22, 0.0  ;;  %v2477_v40 = vrot.slane %v4961_v20, 1  ;;  %v2361_v16 = vshll.u32 %v4961_v20, 16  ;;  %2956 = vmatpush.bf16.msrb.mxu2 %v3620_v48  ;;  %v2359_v44 = vshrl.u32 %v4961_v20, 16 }
 0x1e0   : > { %v2148_v7 = vsel %vm4939_vm13, %v2073_v10, 0.0  ;;  %v4975_v46 = vsel %vm835_vm1, %v2477_v40, %v2478_v9  ;;  %v1921_v9 = vadd.f32 %v1920_v29, %v1862_v58  ;;  %v2363_v21 = vrot.slane %v2361_v16, 1 }
 0x1e1   : > { %v2168_v50 = vpack.c.bf16 %v2148_v7, %v2148_v7  ;;  %2547 = vrot.lane.b32.xlu1 %v4975_v46, %s3760_s14  ;;  %v1925_v25 = vpop.f32.mrf.mxu2 }
 0x1e3   : > { %v2208_v59 = vunpack.c.l.b16 %v2168_v50  ;;  %v2033_v49 = vpop.f32.mrf.mxu0  ;;  %v5016_v60 = vpop.f32.mrf.mxu3 }
 0x1e4   : > { %v2034_v14 = vadd.f32 %v2033_v49, %v1975_v35  ;;  %v1805_v35 = vadd.f32 %v4824_v23, %v4720_v4  ;;  %v1980_v4 = vadd.f32 %v4954_v63, %v1921_v9 }
 0x1e5   : > { %v2225_v52 = vpack.c.b16 %v2208_v59, %v2207_v32 }
 0x1e6   : > { %v2074_v17 = vmax.f32 %v2034_v14, 0.0  ;;  %v1864_v55 = vadd.f32 %v1863_v13, %v1805_v35 }
 0x1e7   : > { %v2248_v5 = vshrl.u32 %v2225_v52, 16  ;;  %v2251_v24 = vshll.u32 %v2225_v52, 16 }
 0x1e8   : > { %v2149_v10 = vsel %vm4992_vm14, %v2074_v17, 0.0  ;;  %v1868_v17 = vpop.f32.mrf.mxu1 }
 0x1e9   : > { %v2250_v3 = vrot.slane %v2248_v5, 7  ;;  %2442 = vrot.lane.b32.xlu1 %v2357_v15, %s3760_s14  ;;  %v2169_v29 = vpack.c.bf16 %v2149_v10, %v2149_v10  ;;  %v2366_v5 = vshll.u32 %v4946_v18, 16  ;;  %v1923_v18 = vadd.f32 %v4983_v2, %v1864_v55  ;;  %v1927_v16 = vpop.f32.mrf.mxu2 }
 0x1eb   : > { %v2253_v22 = vor.u32 %v2251_v24, %v2250_v3  ;;  %v2035_v57 = vpop.f32.mrf.mxu0  ;;  %v2338_v36 = vsel %vm4931_vm12, %v2250_v3, 0  ;;  %v2209_v15 = vunpack.c.l.b16 %v2169_v29  ;;  %v2475_v3 = vrot.slane %v4968_v33, 1  ;;  %v1986_v2 = vpop.f32.mrf.mxu3 }
 0x1ec   : > { %v2036_v40 = vadd.f32 %v2035_v57, %v1977_v45  ;;  %v2481_v31 = vrot.slane %v2338_v36, 1  ;;  %v2378_v53 = vshll.u32 %v2338_v36, 16  ;;  %v2364_v45 = vor.u32 %v2363_v21, %v2359_v44 }
 0x1ed   : > { %v5008_v1 = vsel %vm4931_vm12, 0, %v2253_v22  ;;  %v2107_v22 = vperm.slane %v4848_v61, 4  ;;  %v2476_v57 = vsel %vm835_vm1, %v2474_v0, %v2475_v3  ;;  %v2368_v36 = vrot.slane %v2366_v5, 1 }
 0x1ee   : > { %v2075_v7 = vmax.f32 %v2036_v40, 0.0  ;;  %2564 = vrot.lane.b32.xlu2 %v5008_v1, %s3762_s16  ;;  %v2480_v37 = vrot.slane %v5008_v1, 1  ;;  %v2373_v50 = vshll.u32 %v5008_v1, 16  ;;  %v2371_v49 = vshrl.u32 %v5008_v1, 16 }
 0x1ef   : > { %v2380_v26 = vrot.slane %v2378_v53, 1  ;;  %v1808_v33 = vadd.f32 %v4824_v23, %v4732_v11  ;;  %v5045_v40 = vsel %vm524_vm0, %v2364_v45, %v2368_v36  ;;  %vm5047_vm15 = vcmp.ne.s32.totalorder %v2107_v22, 0 }
 0x1f0   : > { %v2150_v32 = vsel %vm4992_vm14, %v2075_v7, 0.0  ;;  %v5021_v59 = vsel %vm835_vm1, %v2480_v37, %v2481_v31  ;;  %v2375_v14 = vrot.slane %v2373_v50, 1  ;;  %v1982_v50 = vadd.f32 %v4986_v41, %v1923_v18 }
 0x1f1   : > { %v2170_v52 = vpack.c.bf16 %v2150_v32, %v2150_v32  ;;  %2549 = vrot.lane.b32.xlu1 %v5021_v59, %s3760_s14  ;;  %3536 = vmatmul.msk.bf16.vlgmr.msrb.gmra.mxu3 %vm1114_vm2, %v5021_v59  ;;  %v1867_v9 = vadd.f32 %v1866_v51, %v1808_v33  ;;  %v3612_v51 = vld [vmem:[%s5455_s4 + $0x20] sm:$0xff] }
 0x1f2   : > { %v2376_v47 = vor.u32 %v2375_v14, %v2371_v49  ;;  %v1871_v49 = vpop.f32.mrf.mxu1  ;;  %2907 = vmatpush.bf16.msrb.mxu1 %v3612_v51 }
 0x1f3   : > { %v2210_v13 = vunpack.c.l.b16 %v2170_v52  ;;  %v2038_v58 = vpop.f32.mrf.mxu0  ;;  %v1926_v32 = vadd.f32 %v1925_v25, %v1867_v9  ;;  %v1810_v25 = vadd.f32 %v4824_v23, %v4740_v12  ;;  %v1989_v18 = vpop.f32.mrf.mxu3 }
 0x1f4   : > { %v2039_v24 = vadd.f32 %v2038_v58, %v1980_v4  ;;  %v5034_v34 = vsel %vm524_vm0, %v2376_v47, %v2380_v26 }
 0x1f5   : > { %v2226_v63 = vpack.c.b16 %v2210_v13, %v2209_v15  ;;  %2592 = vrot.lane.b32.xlu0 %v5034_v34, %s3761_s15  ;;  %v1930_v13 = vpop.f32.mrf.mxu2  ;;  %v1869_v3 = vadd.f32 %v1868_v17, %v1810_v25  ;;  %v1985_v12 = vadd.f32 %v5016_v60, %v1926_v32  ;;  %v1813_v60 = vadd.f32 %v4824_v23, %v4748_v56 }
 0x1f6   : > { %2498 = vrot.lane.b32.xlu2 %v2476_v57, %s3762_s16  ;;  %v2076_v10 = vmax.f32 %v2039_v24, 0.0 }
 0x1f7   : > { %v2255_v48 = vshrl.u32 %v2226_v63, 16  ;;  %v2258_v7 = vshll.u32 %v2226_v63, 16  ;;  %v1928_v9 = vadd.f32 %v1927_v16, %v1869_v3  ;;  %v1872_v37 = vadd.f32 %v1871_v49, %v1813_v60 }
 0x1f8   : > { %v2151_v29 = vsel %vm5047_vm15, %v2076_v10, 0.0  ;;  %v2108_v10 = vperm.slane %v4848_v61, 5 }
 0x1f9   : > { %v2257_v31 = vrot.slane %v2255_v48, 7  ;;  %2444 = vrot.lane.b32.xlu1 %v5045_v40, %s3760_s14  ;;  %v2171_v47 = vpack.c.bf16 %v2151_v29, %v2151_v29  ;;  %v1987_v16 = vadd.f32 %v1986_v2, %v1928_v9  ;;  %v3619_v29 = vld [vmem:[%s5455_s4 + $0x58] sm:$0xff] }
 0x1fa   : > { %v1873_v17 = vpop.f32.mrf.mxu1  ;;  %vm5094_vm5 = vcmp.ne.s32.totalorder %v2108_v10, 0  ;;  %2957 = vmatpush.bf16.msrb.mxu2 %v3619_v29 }
 0x1fb   : > { %v2260_v11 = vor.u32 %v2258_v7, %v2257_v31  ;;  %v2040_v53 = vpop.f32.mrf.mxu0  ;;  %v2339_v35 = vsel %vm4931_vm12, %v2257_v31, 0  ;;  %v2211_v63 = vunpack.c.l.b16 %v2171_v47 }
 0x1fc   : > { %v2041_v21 = vadd.f32 %v2040_v53, %v1982_v50  ;;  %v2484_v14 = vrot.slane %v2339_v35, 1  ;;  %v2390_v0 = vshll.u32 %v2339_v35, 16 }
 0x1fd   : > { %2515 = vrot.lane.b32.xlu0 %v4961_v20, %s3761_s15  ;;  %v5065_v41 = vsel %vm4931_vm12, 0, %v2260_v11  ;;  %v1932_v35 = vpop.f32.mrf.mxu2 }
 0x1fe   : > { %v2077_v55 = vmax.f32 %v2041_v21, 0.0  ;;  %2566 = vrot.lane.b32.xlu2 %v5065_v41, %s3762_s16  ;;  %v2483_v52 = vrot.slane %v5065_v41, 1  ;;  %v2385_v4 = vshll.u32 %v5065_v41, 16  ;;  %v2383_v5 = vshrl.u32 %v5065_v41, 16  ;;  %v3611_v21 = vld [vmem:[%s5455_s4 + $0x18] sm:$0xff] }
 0x1ff   : > { %v2392_v45 = vrot.slane %v2390_v0, 1  ;;  %2908 = vmatpush.bf16.msrb.mxu1 %v3611_v21  ;;  %v3618_v21 = vld [vmem:[%s5455_s4 + $0x50] sm:$0xff] }
 0x200   : > { %v2152_v26 = vsel %vm5047_vm15, %v2077_v55, 0.0  ;;  %v5076_v44 = vsel %vm835_vm1, %v2483_v52, %v2484_v14  ;;  %v2387_v15 = vrot.slane %v2385_v4, 1  ;;  %v1931_v14 = vadd.f32 %v1930_v13, %v1872_v37  ;;  %v1991_v52 = vpop.f32.mrf.mxu3  ;;  %2958 = vmatpush.bf16.msrb.mxu2 %v3618_v21 }
 0x201   : > { %v2172_v58 = vpack.c.bf16 %v2152_v26, %v2152_v26  ;;  %2551 = vrot.lane.b32.xlu1 %v5076_v44, %s3760_s14  ;;  %3537 = vmatmul.msk.bf16.gmra.mxu3 %vm1114_vm2, %v5076_v44  ;;  %v1815_v26 = vadd.f32 %v4824_v23, %v4760_v42 }
 0x202   : > { %v2388_v24 = vor.u32 %v2387_v15, %v2383_v5  ;;  %v1990_v42 = vadd.f32 %v1989_v18, %v1931_v14  ;;  %v1818_v18 = vadd.f32 %v4824_v23, %v4771_v54 }
 0x203   : > { %v2212_v22 = vunpack.c.l.b16 %v2172_v58  ;;  %v2043_v57 = vpop.f32.mrf.mxu0 }
 0x204   : > { %v2044_v36 = vadd.f32 %v2043_v57, %v1985_v12  ;;  %v5085_v33 = vsel %vm524_vm0, %v2388_v24, %v2392_v45  ;;  %v1876_v12 = vpop.f32.mrf.mxu1  ;;  %v1874_v45 = vadd.f32 %v1873_v17, %v1815_v26 }
 0x205   : > { %v2227_v48 = vpack.c.b16 %v2212_v22, %v2211_v63  ;;  %2594 = vrot.lane.b32.xlu0 %v5085_v33, %s3761_s15  ;;  %v1935_v60 = vpop.f32.mrf.mxu2  ;;  %v1877_v53 = vadd.f32 %v1876_v12, %v1818_v18  ;;  %v2090_v18 = vadd.s32 8, %v4826_v27 }
 0x206   : > { %2500 = vrot.lane.b32.xlu2 %v4975_v46, %s3762_s16  ;;  %v2078_v7 = vmax.f32 %v2044_v36, 0.0  ;;  %v1933_v37 = vadd.f32 %v1932_v35, %v1874_v45 }
 0x207   : > { %v2262_v31 = vshrl.u32 %v2227_v48, 16  ;;  %v2265_v11 = vshll.u32 %v2227_v48, 16 }
 0x208   : > { %v2153_v32 = vsel %vm5094_vm5, %v2078_v7, 0.0  ;;  %v2109_v7 = vperm.slane %v4848_v61, 6  ;;  %v1992_v35 = vadd.f32 %v1991_v52, %v1933_v37 }
 0x209   : > { %v2264_v50 = vrot.slane %v2262_v31, 7  ;;  %2446 = vrot.lane.b32.xlu1 %v5034_v34, %s3760_s14  ;;  %v2173_v5 = vpack.c.bf16 %v2153_v32, %v2153_v32  ;;  %v3610_v32 = vld [vmem:[%s5455_s4 + $0x10] sm:$0xff] }
 0x20a   : > { %vm5142_vm6 = vcmp.ne.s32.totalorder %v2109_v7, 0  ;;  %2909 = vmatpush.bf16.msrb.mxu1 %v3610_v32  ;;  %v3609_v32 = vld [vmem:[%s5455_s4 + $0x8] sm:$0xff] }
 0x20b   : > { %v2267_v51 = vor.u32 %v2265_v11, %v2264_v50  ;;  %v2045_v46 = vpop.f32.mrf.mxu0  ;;  %v2340_v56 = vsel %vm4931_vm12, %v2264_v50, 0  ;;  %v2213_v57 = vunpack.c.l.b16 %v2173_v5  ;;  %v1994_v50 = vpop.f32.mrf.mxu3  ;;  %v1820_v5 = vadd.f32 %v4824_v23, %v4779_v8 }
 0x20c   : > { %v2046_v49 = vadd.f32 %v2045_v46, %v1987_v16  ;;  %v2487_v55 = vrot.slane %v2340_v56, 1  ;;  %v2402_v47 = vshll.u32 %v2340_v56, 16  ;;  %v1878_v56 = vpop.f32.mrf.mxu1 }
 0x20d   : > { %2517 = vrot.lane.b32.xlu0 %v5008_v1, %s3761_s15  ;;  %v5114_v2 = vsel %vm4931_vm12, 0, %v2267_v51  ;;  %v1879_v8 = vadd.f32 %v1878_v56, %v1820_v5 }
 0x20e   : > { %v2079_v4 = vmax.f32 %v2046_v49, 0.0  ;;  %2568 = vrot.lane.b32.xlu2 %v5114_v2, %s3762_s16  ;;  %v2486_v0 = vrot.slane %v5114_v2, 1  ;;  %v2397_v25 = vshll.u32 %v5114_v2, 16  ;;  %v2395_v58 = vshrl.u32 %v5114_v2, 16  ;;  %2910 = vmatpush.bf16.msrb.mxu1 %v3609_v32  ;;  %v3608_v32 = vld [vmem:[%s5455_s4] sm:$0xff] }
 0x20f   : > { %v2404_v22 = vrot.slane %v2402_v47, 1 }
 0x210   : > { %v2154_v15 = vsel %vm5094_vm5, %v2079_v4, 0.0  ;;  %v5125_v13 = vsel %vm835_vm1, %v2486_v0, %v2487_v55  ;;  %v2399_v3 = vrot.slane %v2397_v25, 1  ;;  %v1936_v55 = vadd.f32 %v1935_v60, %v1877_v53 }
 0x211   : > { %v2174_v24 = vpack.c.bf16 %v2154_v15, %v2154_v15  ;;  %2553 = vrot.lane.b32.xlu1 %v5125_v13, %s3760_s14  ;;  %3538 = vmatmul.msk.bf16.gmra.mxu3 %vm1114_vm2, %v5125_v13  ;;  %v1937_v15 = vpop.f32.mrf.mxu2 }
 0x212   : > { %v2400_v63 = vor.u32 %v2399_v3, %v2395_v58  ;;  %2911 = vmatpush.bf16.msrb.mxu1 %v3608_v32 }
 0x213   : > { %v2214_v36 = vunpack.c.l.b16 %v2174_v24  ;;  %v2048_v48 = vpop.f32.mrf.mxu0 }
 0x214   : > { %v2049_v10 = vadd.f32 %v2048_v48, %v1990_v42  ;;  %v5133_v9 = vsel %vm524_vm0, %v2400_v63, %v2404_v22  ;;  %v1996_v63 = vpop.f32.mrf.mxu3  ;;  %v1995_v22 = vadd.f32 %v1994_v50, %v1936_v55  ;;  %v1881_v48 = vpop.f32.mrf.mxu1  ;;  %v1938_v50 = vadd.f32 %v1937_v15, %v1879_v8 }
 0x215   : > { %v2228_v31 = vpack.c.b16 %v2214_v36, %v2213_v57  ;;  %2596 = vrot.lane.b32.xlu0 %v5133_v9, %s3761_s15 }
 0x216   : > { %2502 = vrot.lane.b32.xlu2 %v5021_v59, %s3762_s16  ;;  %v2080_v11 = vmax.f32 %v2049_v10, 0.0 }
 0x217   : > { %v2269_v17 = vshrl.u32 %v2228_v31, 16  ;;  %v2272_v51 = vshll.u32 %v2228_v31, 16 }
 0x218   : > { %v2155_v49 = vsel %vm5142_vm6, %v2080_v11, 0.0  ;;  %v2110_v11 = vperm.slane %v4848_v61, 7 }
 0x219   : > { %v2271_v16 = vrot.slane %v2269_v17, 7  ;;  %2448 = vrot.lane.b32.xlu1 %v5085_v33, %s3760_s14  ;;  %v2175_v58 = vpack.c.bf16 %v2155_v49, %v2155_v49  ;;  %v1940_v53 = vpop.f32.mrf.mxu2 }
 0x21a   : > { %vm5193_vm7 = vcmp.ne.s32.totalorder %v2110_v11, 0 }
 0x21b   : > { %v2274_v29 = vor.u32 %v2272_v51, %v2271_v16  ;;  %v2050_v59 = vpop.f32.mrf.mxu0  ;;  %v2341_v54 = vsel %vm4931_vm12, %v2271_v16, 0  ;;  %v2215_v10 = vunpack.c.l.b16 %v2175_v58  ;;  %v1823_v51 = vadd.f32 %v4824_v23, %v4790_v28 }
 0x21c   : > { %v2051_v14 = vadd.f32 %v2050_v59, %v1992_v35  ;;  %v2490_v4 = vrot.slane %v2341_v54, 1  ;;  %v2414_v26 = vshll.u32 %v2341_v54, 16  ;;  %v2094_v35 = vadd.s32 %v2092_v43, %v2090_v18  ;;  %v3617_v43 = vld [vmem:[%s5455_s4 + $0x48] sm:$0xff]  ;;  %v1883_v55 = vpop.f32.mrf.mxu1 }
 0x21d   : > { %2519 = vrot.lane.b32.xlu0 %v5065_v41, %s3761_s15  ;;  %v5162_v52 = vsel %vm4931_vm12, 0, %v2274_v29  ;;  %v1882_v61 = vadd.f32 %v1881_v48, %v1823_v51  ;;  %v1997_v59 = vadd.f32 %v1996_v63, %v1938_v50  ;;  %2959 = vmatpush.bf16.msrb.mxu2 %v3617_v43 }
 0x21e   : > { %v2081_v0 = vmax.f32 %v2051_v14, 0.0  ;;  %2570 = vrot.lane.b32.xlu2 %v5162_v52, %s3762_s16  ;;  %v2489_v25 = vrot.slane %v5162_v52, 1  ;;  %v2409_v47 = vshll.u32 %v5162_v52, 16  ;;  %v2407_v24 = vshrl.u32 %v5162_v52, 16 }
 0x21f   : > { %v2416_v36 = vrot.slane %v2414_v26, 1  ;;  %vm2096_vm8 = vcmp.ge.s32.totalorder %v2094_v35, 0  ;;  %vm2098_vm9 = vcmp.lt.s32.totalorder %v2094_v35, 16 }
 0x220   : > { %v2156_v3 = vsel %vm5142_vm6, %v2081_v0, 0.0  ;;  %v5173_v12 = vsel %vm835_vm1, %v2489_v25, %v2490_v4  ;;  %v2411_v45 = vrot.slane %v2409_v47, 1  ;;  %v1941_v0 = vadd.f32 %v1940_v53, %v1882_v61  ;;  %vm2100_vm10 = vmand %vm2096_vm8, %vm2098_vm9 }
 0x221   : > { %v2176_v42 = vpack.c.bf16 %v2156_v3, %v2156_v3  ;;  %2555 = vrot.lane.b32.xlu1 %v5173_v12, %s3760_s14  ;;  %3539 = vmatmul.msk.bf16.gmra.mxu3 %vm1114_vm2, %v5173_v12  ;;  %v1825_v3 = vadd.f32 %v4824_v23, %v4803_v38  ;;  %v5232_v38 = vsel %vm2100_vm10, 1, %v3763_v6  ;;  %v1828_v6 = vadd.f32 %v4824_v23, %v4818_v39 }
 0x222   : > { %v2412_v57 = vor.u32 %v2411_v45, %v2407_v24  ;;  %v2111_v53 = vperm.slane %v5232_v38, 0 }
 0x223   : > { %v2216_v60 = vunpack.c.l.b16 %v2176_v42  ;;  %v2053_v31 = vpop.f32.mrf.mxu0  ;;  %v1942_v42 = vpop.f32.mrf.mxu2 }
 0x224   : > { %v2054_v7 = vadd.f32 %v2053_v31, %v1995_v22  ;;  %v5181_v37 = vsel %vm524_vm0, %v2412_v57, %v2416_v36  ;;  %v1884_v36 = vadd.f32 %v1883_v55, %v1825_v3  ;;  %v1886_v11 = vpop.f32.mrf.mxu1  ;;  %vm5247_vm11 = vcmp.ne.s32.totalorder %v2111_v53, 0 }
 0x225   : > { %v2229_v17 = vpack.c.b16 %v2216_v60, %v2215_v10  ;;  %2598 = vrot.lane.b32.xlu0 %v5181_v37, %s3761_s15 }
 0x226   : > { %2504 = vrot.lane.b32.xlu2 %v5076_v44, %s3762_s16  ;;  %v2082_v46 = vmax.f32 %v2054_v7, 0.0  ;;  %v1999_v44 = vpop.f32.mrf.mxu3  ;;  %v1943_v51 = vadd.f32 %v1942_v42, %v1884_v36 }
 0x227   : > { %v2276_v16 = vshrl.u32 %v2229_v17, 16  ;;  %v2279_v27 = vshll.u32 %v2229_v17, 16  ;;  %v2000_v57 = vadd.f32 %v1999_v44, %v1941_v0 }
 0x228   : > { %v2157_v49 = vsel %vm5193_vm7, %v2082_v46, 0.0 }
 0x229   : > { %v2278_v56 = vrot.slane %v2276_v16, 7  ;;  %2450 = vrot.lane.b32.xlu1 %v5133_v9, %s3760_s14  ;;  %v2177_v5 = vpack.c.bf16 %v2157_v49, %v2157_v49 }
 0x22b   : > { %v2281_v54 = vor.u32 %v2279_v27, %v2278_v56  ;;  %v2055_v21 = vpop.f32.mrf.mxu0  ;;  %v2342_v28 = vsel %vm4931_vm12, %v2278_v56, 0  ;;  %v2217_v48 = vunpack.c.l.b16 %v2177_v5  ;;  %v3616_v56 = vld [vmem:[%s5455_s4 + $0x40] sm:$0xff]  ;;  %v1887_v27 = vadd.f32 %v1886_v11, %v1828_v6  ;;  %v1945_v29 = vpop.f32.mrf.mxu2 }
 0x22c   : > { %v2056_v14 = vadd.f32 %v2055_v21, %v1997_v59  ;;  %v2493_v26 = vrot.slane %v2342_v28, 1  ;;  %v2426_v58 = vshll.u32 %v2342_v28, 16  ;;  %2960 = vmatpush.bf16.msrb.mxu2 %v3616_v56  ;;  %v2112_v11 = vperm.slane %v5232_v38, 1 }
 0x22d   : > { %2521 = vrot.lane.b32.xlu0 %v5114_v2, %s3761_s15  ;;  %v5213_v4 = vsel %vm4931_vm12, 0, %v2281_v54  ;;  %v1946_v49 = vadd.f32 %v1945_v29, %v1887_v27 }
 0x22e   : > { %v2083_v25 = vmax.f32 %v2056_v14, 0.0  ;;  %2572 = vrot.lane.b32.xlu2 %v5213_v4, %s3762_s16  ;;  %v2492_v47 = vrot.slane %v5213_v4, 1  ;;  %v2421_v15 = vshll.u32 %v5213_v4, 16  ;;  %v2419_v8 = vshrl.u32 %v5213_v4, 16  ;;  %v2001_v17 = vpop.f32.mrf.mxu3 }
 0x22f   : > { %v2428_v7 = vrot.slane %v2426_v58, 1  ;;  %v1888_v58 = vpop.f32.mrf.mxu1  ;;  %vm5290_vm13 = vcmp.ne.s32.totalorder %v2112_v11, 0 }
 0x230   : > { %v2158_v24 = vsel %vm5193_vm7, %v2083_v25, 0.0  ;;  %v5224_v45 = vsel %vm835_vm1, %v2492_v47, %v2493_v26  ;;  %v2423_v22 = vrot.slane %v2421_v15, 1  ;;  %v1830_v15 = vadd.f32 %v4824_v23, %v4838_v30 }
 0x231   : > { %v2178_v63 = vpack.c.bf16 %v2158_v24, %v2158_v24  ;;  %2557 = vrot.lane.b32.xlu1 %v5224_v45, %s3760_s14  ;;  %3540 = vmatmul.msk.bf16.gmra.mxu3 %vm1114_vm2, %v5224_v45 }
 0x232   : > { %v2424_v31 = vor.u32 %v2423_v22, %v2419_v8  ;;  %v1889_v30 = vadd.f32 %v1888_v58, %v1830_v15 }
 0x233   : > { %v2218_v10 = vunpack.c.l.b16 %v2178_v63  ;;  %v2058_v60 = vpop.f32.mrf.mxu0 }
 0x234   : > { %v2059_v18 = vadd.f32 %v2058_v60, %v2000_v57  ;;  %v5236_v16 = vsel %vm524_vm0, %v2424_v31, %v2428_v7 }
 0x235   : > { %v2230_v50 = vpack.c.b16 %v2218_v10, %v2217_v48  ;;  %2600 = vrot.lane.b32.xlu0 %v5236_v16, %s3761_s15  ;;  %v1947_v48 = vpop.f32.mrf.mxu2 }
 0x236   : > { %2506 = vrot.lane.b32.xlu2 %v5125_v13, %s3762_s16  ;;  %v2084_v35 = vmax.f32 %v2059_v18, 0.0  ;;  %v2002_v13 = vadd.f32 %v2001_v17, %v1943_v51  ;;  %v2004_v14 = vpop.f32.mrf.mxu3 }
 0x237   : > { %v2283_v46 = vshrl.u32 %v2230_v50, 16  ;;  %v2286_v59 = vshll.u32 %v2230_v50, 16  ;;  %v2005_v23 = vadd.f32 %v2004_v14, %v1946_v49  ;;  %v1948_v50 = vadd.f32 %v1947_v48, %v1889_v30 }
 0x238   : > { %v2159_v28 = vsel %vm5247_vm11, %v2084_v35, 0.0 }
 0x239   : > { %v2285_v61 = vrot.slane %v2283_v46, 7  ;;  %2452 = vrot.lane.b32.xlu1 %v5181_v37, %s3760_s14  ;;  %v2179_v3 = vpack.c.bf16 %v2159_v28, %v2159_v28 }
 0x23b   : > { %v2288_v39 = vor.u32 %v2286_v59, %v2285_v61  ;;  %v2060_v54 = vpop.f32.mrf.mxu0  ;;  %v2343_v21 = vsel %vm4931_vm12, %v2285_v61, 0  ;;  %v2219_v10 = vunpack.c.l.b16 %v2179_v3 }
 0x23c   : > { %v2061_v43 = vadd.f32 %v2060_v54, %v2002_v13  ;;  %v2496_v0 = vrot.slane %v2343_v21, 1  ;;  %v2438_v5 = vshll.u32 %v2343_v21, 16 }
 0x23d   : > { %v5262_v55 = vsel %vm4931_vm12, 0, %v2288_v39  ;;  %2523 = vrot.lane.b32.xlu0 %v5162_v52, %s3761_s15 }
 0x23e   : > { %v2085_v25 = vmax.f32 %v2061_v43, 0.0  ;;  %2574 = vrot.lane.b32.xlu2 %v5262_v55, %s3762_s16  ;;  %v2495_v47 = vrot.slane %v5262_v55, 1  ;;  %v2433_v26 = vshll.u32 %v5262_v55, 16  ;;  %v2431_v63 = vshrl.u32 %v5262_v55, 16  ;;  %v2006_v53 = vpop.f32.mrf.mxu3 }
 0x23f   : > { %v2440_v36 = vrot.slane %v2438_v5, 1  ;;  %v2007_v38 = vadd.f32 %v2006_v53, %v1948_v50 }
 0x240   : > { %v2160_v24 = vsel %vm5247_vm11, %v2085_v25, 0.0  ;;  %v5275_v42 = vsel %vm835_vm1, %v2495_v47, %v2496_v0  ;;  %v2435_v8 = vrot.slane %v2433_v26, 1 }
 0x241   : > { %v2180_v22 = vpack.c.bf16 %v2160_v24, %v2160_v24  ;;  %2559 = vrot.lane.b32.xlu1 %v5275_v42, %s3760_s14  ;;  %3541 = vmatmul.msk.bf16.gmra.mxu3 %vm1114_vm2, %v5275_v42 }
 0x242   : > { %v2436_v57 = vor.u32 %v2435_v8, %v2431_v63 }
 0x243   : > { %v2220_v60 = vunpack.c.l.b16 %v2180_v22  ;;  %v2063_v31 = vpop.f32.mrf.mxu0 }
 0x244   : > { %v2064_v7 = vadd.f32 %v2063_v31, %v2005_v23  ;;  %v5283_v18 = vsel %vm524_vm0, %v2436_v57, %v2440_v36 }
 0x245   : > { %v2231_v17 = vpack.c.b16 %v2220_v60, %v2219_v10  ;;  %2602 = vrot.lane.b32.xlu0 %v5283_v18, %s3761_s15 }
 0x246   : > { %2508 = vrot.lane.b32.xlu2 %v5173_v12, %s3762_s16  ;;  %v2086_v6 = vmax.f32 %v2064_v7, 0.0 }
 0x247   : > { %v2290_v51 = vshrl.u32 %v2231_v17, 16  ;;  %v2293_v35 = vshll.u32 %v2231_v17, 16 }
 0x248   : > { %v5294_v27 = vpop.permute.xlu2 %2564  ;;  %v2161_v59 = vsel %vm5290_vm13, %v2086_v6, 0.0 }
 0x249   : > { %v2292_v46 = vrot.slane %v2290_v51, 7  ;;  %2454 = vrot.lane.b32.xlu1 %v5236_v16, %s3760_s14  ;;  %v2181_v32 = vpack.c.bf16 %v2161_v59, %v2161_v59 }
 0x24b   : > { %v2065_v29 = vpop.f32.mrf.mxu0  ;;  %v2295_v61 = vor.u32 %v2293_v35, %v2292_v46  ;;  %v2344_v12 = vsel %vm4931_vm12, %v2292_v46, 0  ;;  %v2221_v15 = vunpack.c.l.b16 %v2181_v32 }
 0x24c   : > { %v2066_v44 = vadd.f32 %v2065_v29, %v2007_v38  ;;  %v2545_v39 = vrot.slane %v2344_v12, 1  ;;  %v2539_v43 = vshll.u32 %v2344_v12, 16 }
 0x24d   : > { %v2334_v13 = vsel %vm4931_vm12, 0, %v2295_v61  ;;  %2525 = vrot.lane.b32.xlu0 %v5213_v4, %s3761_s15 }
 0x24e   : > { %v2087_v54 = vmax.f32 %v2066_v44, 0.0  ;;  %2576 = vrot.lane.b32.xlu2 %v2334_v13, %s3762_s16  ;;  %v2544_v21 = vrot.slane %v2334_v13, 1  ;;  %v2534_v28 = vshll.u32 %v2334_v13, 16  ;;  %v2532_v0 = vshrl.u32 %v2334_v13, 16 }
 0x24f   : > { %v2541_v5 = vrot.slane %v2539_v43, 1 }
 0x250   : > { %v2162_v49 = vsel %vm5290_vm13, %v2087_v54, 0.0  ;;  %v2546_v14 = vsel %vm835_vm1, %v2544_v21, %v2545_v39  ;;  %v2536_v25 = vrot.slane %v2534_v28, 1  ;;  %v2499_v3 = vpop.permute.xlu2 %2498 }
 0x251   : > { %v2182_v47 = vpack.c.bf16 %v2162_v49, %v2162_v49  ;;  %2561 = vrot.lane.b32.xlu1 %v2546_v14, %s3760_s14  ;;  %3542 = vmatmul.msk.bf16.gmra.mxu3 %vm1114_vm2, %v2546_v14 }
 0x252   : > { %v2537_v26 = vor.u32 %v2536_v25, %v2532_v0 }
 0x253   : > { %v2222_v58 = vunpack.c.l.b16 %v2182_v47  ;;  %v2548_v24 = vpop.permute.xlu1 %2547 }
 0x254   : > { %v5313_v63 = vsel %vm524_vm0, %v2537_v26, %v2541_v5  ;;  %v2670_v62 = vsel %vm1114_vm2, %v5045_v40, %v2548_v24 }
 0x255   : > { %v2232_v8 = vpack.c.b16 %v2222_v58, %v2221_v15  ;;  %2604 = vrot.lane.b32.xlu0 %v5313_v63, %s3761_s15  ;;  %v2693_v29 = vsel %vm1135_vm3, %v2670_v62, %v5294_v27 }
 0x256   : > { %2510 = vrot.lane.b32.xlu2 %v5224_v45, %s3762_s16 }
 0x257   : > { %v2297_v22 = vshrl.u32 %v2232_v8, 16  ;;  %v2300_v30 = vshll.u32 %v2232_v8, 16 }
 0x258   : > { %v2567_v10 = vpop.permute.xlu2 %2566 }
 0x259   : > { %2456 = vrot.lane.b32.xlu1 %v5283_v18, %s3760_s14  ;;  %v2299_v23 = vrot.slane %v2297_v22, 7 }
 0x25b   : > { %v2443_v57 = vpop.permute.xlu1 %2442  ;;  %v2302_v36 = vor.u32 %v2300_v30, %v2299_v23  ;;  %v2345_v48 = vsel %vm4931_vm12, %v2299_v23, 0 }
 0x25c   : > { %v2610_v7 = vrot.slane %v2345_v48, 1  ;;  %v2588_v17 = vshll.u32 %v2345_v48, 16  ;;  %v2613_v59 = vsel %vm1114_vm2, %v4937_v19, %v2443_v57 }
 0x25d   : > { %v2335_v60 = vsel %vm4931_vm12, 0, %v2302_v36  ;;  %2527 = vrot.lane.b32.xlu0 %v5262_v55, %s3761_s15  ;;  %v2629_v44 = vsel %vm1135_vm3, %v2613_v59, %v2499_v3 }
 0x25e   : > { %2578 = vrot.lane.b32.xlu2 %v2335_v60, %s3762_s16  ;;  %v2583_v45 = vshll.u32 %v2335_v60, 16  ;;  %v2609_v31 = vrot.slane %v2335_v60, 1  ;;  %v2581_v11 = vshrl.u32 %v2335_v60, 16  ;;  %v2590_v6 = vrot.slane %v2588_v17, 1 }
 0x260   : > { %v2585_v50 = vrot.slane %v2583_v45, 1  ;;  %v2611_v53 = vsel %vm835_vm1, %v2609_v31, %v2610_v7  ;;  %v2501_v56 = vpop.permute.xlu2 %2500 }
 0x261   : > { %3543 = vmatmul.msk.bf16.gmra.mxu3 %vm1114_vm2, %v2611_v53 }
 0x262   : > { %v2586_v51 = vor.u32 %v2585_v50, %v2581_v11 }
 0x263   : > { %v2550_v46 = vpop.permute.xlu1 %2549 }
 0x264   : > { %v2591_v35 = vsel %vm524_vm0, %v2586_v51, %v2590_v6  ;;  %v2673_v27 = vsel %vm1114_vm2, %v5034_v34, %v2550_v46 }
 0x265   : > { %2606 = vrot.lane.b32.xlu0 %v2591_v35, %s3761_s15  ;;  %v2695_v28 = vsel %vm1135_vm3, %v2673_v27, %v2567_v10 }
 0x266   : > { %2512 = vrot.lane.b32.xlu2 %v5275_v42, %s3762_s16  ;;  %s3206_s16 = sshll.u32 %s3742_s21, 4 }
 0x267   : > { %v2593_v38 = vpop.permute.xlu0 %2592  ;;  %p288_p6 = scmp.lt.s32.totalorder %s3206_s16, 31 }
 0x268   : > { %v2709_v61 = vsel %vm1156_vm4, %v2693_v29, %v2593_v38  ;;  %v2569_v42 = vpop.permute.xlu2 %2568 }
 0x269   : > { %2961 = vmatmul.bf16.vlgmr.msrb.gmra.mxu2 %v2709_v61  ;;  %s5505_s16 = smov (!%p288_p6, %s3206_s16), 31 }
 0x26a   : > { %s291_s12 = sadd.s32 %s3207_s11, %s5505_s16 }
 0x26b   : > { %v2445_v12 = vpop.permute.xlu1 %2444  ;;  %s3208_s17 = sshll.u32 %s291_s12, 2 }
 0x26c   : > { %s5412_s19 = scalar_lea.vmem %s5457_s6, %s3208_s17 }
 0x26d   : > { %2529 = vrot.lane.b32.xlu0 %v2334_v13, %s3761_s15  ;;  %v2615_v13 = vsel %vm1114_vm2, %v4961_v20, %v2445_v12 }
 0x26e   : > { %v2631_v14 = vsel %vm1135_vm3, %v2615_v13, %v2501_v56 }
 0x26f   : > { %v2516_v40 = vpop.permute.xlu0 %2515 }
 0x270   : > { %v2645_v39 = vsel %vm1156_vm4, %v2629_v44, %v2516_v40  ;;  %v2503_v19 = vpop.permute.xlu2 %2502 }
 0x271   : > { %2912 = vmatmul.bf16.vlgmr.msrb.gmra.mxu1 %v2645_v39 }
 0x273   : > { %v2552_v54 = vpop.permute.xlu1 %2551 }
 0x274   : > { %v2676_v34 = vsel %vm1114_vm2, %v5085_v33, %v2552_v54 }
 0x275   : > { %v2697_v5 = vsel %vm1135_vm3, %v2676_v34, %v2569_v42 }
 0x277   : > { %v2595_v21 = vpop.permute.xlu0 %2594 }
 0x278   : > { %v2712_v43 = vsel %vm1156_vm4, %v2695_v28, %v2595_v21  ;;  %v2571_v47 = vpop.permute.xlu2 %2570 }
 0x279   : > { %2966 = vmatmul.bf16.gmra.mxu2 %v2712_v43 }
 0x27b   : > { %v2447_v32 = vpop.permute.xlu1 %2446 }
 0x27c   : > { %v2617_v20 = vsel %vm1114_vm2, %v5008_v1, %v2447_v32 }
 0x27d   : > { %v2633_v8 = vsel %vm1135_vm3, %v2617_v20, %v2503_v19 }
 0x27f   : > { %v2518_v49 = vpop.permute.xlu0 %2517 }
 0x280   : > { %v2648_v0 = vsel %vm1156_vm4, %v2631_v14, %v2518_v49  ;;  %v2505_v3 = vpop.permute.xlu2 %2504  ;;  %v3011_v49 = vpop.f32.mrf.mxu3 }
 0x281   : > { %2917 = vmatmul.bf16.gmra.mxu1 %v2648_v0 }
 0x283   : > { %v2554_v25 = vpop.permute.xlu1 %2553 }
 0x284   : > { %v2679_v33 = vsel %vm1114_vm2, %v5133_v9, %v2554_v25 }
 0x285   : > { %v2699_v57 = vsel %vm1135_vm3, %v2679_v33, %v2571_v47 }
 0x287   : > { %v2597_v26 = vpop.permute.xlu0 %2596 }
 0x288   : > { %v2715_v15 = vsel %vm1156_vm4, %v2697_v5, %v2597_v26  ;;  %v2573_v48 = vpop.permute.xlu2 %2572  ;;  %v3013_v26 = vpop.f32.mrf.mxu3 }
 0x289   : > { %2971 = vmatmul.bf16.gmra.mxu2 %v2715_v15 }
 0x28b   : > { %v2449_v58 = vpop.permute.xlu1 %2448 }
 0x28c   : > { %v2619_v1 = vsel %vm1114_vm2, %v5065_v41, %v2449_v58 }
 0x28d   : > { %v2635_v45 = vsel %vm1135_vm3, %v2619_v1, %v2505_v3 }
 0x28f   : > { %v2520_v24 = vpop.permute.xlu0 %2519 }
 0x290   : > { %v2651_v22 = vsel %vm1156_vm4, %v2633_v8, %v2520_v24  ;;  %v2507_v7 = vpop.permute.xlu2 %2506  ;;  %v5403_v24 = vld [vmem:[%s5456_s5] ss:$0 sm:$0xff] }
 0x291   : > { %2922 = vmatmul.bf16.gmra.mxu1 %v2651_v22 }
 0x293   : > { %v2556_v23 = vpop.permute.xlu1 %2555 }
 0x294   : > { %v2682_v9 = vsel %vm1114_vm2, %v5181_v37, %v2556_v23 }
 0x295   : > { %v2701_v50 = vsel %vm1135_vm3, %v2682_v9, %v2573_v48 }
 0x297   : > { %v2599_v30 = vpop.permute.xlu0 %2598 }
 0x298   : > { %v2718_v36 = vsel %vm1156_vm4, %v2699_v57, %v2599_v30  ;;  %v2575_v51 = vpop.permute.xlu2 %2574 }
 0x299   : > { %2976 = vmatmul.bf16.gmra.mxu2 %v2718_v36 }
 0x29b   : > { %v2451_v10 = vpop.permute.xlu1 %2450 }
 0x29c   : > { %v2621_v41 = vsel %vm1114_vm2, %v5114_v2, %v2451_v10 }
 0x29d   : > { %v2637_v46 = vsel %vm1135_vm3, %v2621_v41, %v2507_v7 }
 0x29f   : > { %v2522_v60 = vpop.permute.xlu0 %2521 }
 0x2a0   : > { %v2654_v31 = vsel %vm1156_vm4, %v2635_v45, %v2522_v60  ;;  %v2509_v56 = vpop.permute.xlu2 %2508 }
 0x2a1   : > { %2927 = vmatmul.bf16.gmra.mxu1 %v2654_v31 }
 0x2a3   : > { %v2558_v17 = vpop.permute.xlu1 %2557 }
 0x2a4   : > { %v2685_v37 = vsel %vm1114_vm2, %v5236_v16, %v2558_v17 }
 0x2a5   : > { %v2703_v29 = vsel %vm1135_vm3, %v2685_v37, %v2575_v51 }
 0x2a7   : > { %v2601_v11 = vpop.permute.xlu0 %2600 }
 0x2a8   : > { %v2721_v53 = vsel %vm1156_vm4, %v2701_v50, %v2601_v11  ;;  %v2577_v44 = vpop.permute.xlu2 %2576 }
 0x2a9   : > { %2981 = vmatmul.bf16.gmra.mxu2 %v2721_v53 }
 0x2ab   : > { %v2453_v35 = vpop.permute.xlu1 %2452 }
 0x2ac   : > { %v2623_v2 = vsel %vm1114_vm2, %v5162_v52, %v2453_v35 }
 0x2ad   : > { %v2639_v40 = vsel %vm1135_vm3, %v2623_v2, %v2509_v56 }
 0x2af   : > { %v2524_v6 = vpop.permute.xlu0 %2523 }
 0x2b0   : > { %v2657_v62 = vsel %vm1156_vm4, %v2637_v46, %v2524_v6  ;;  %v2511_v28 = vpop.permute.xlu2 %2510 }
 0x2b1   : > { %2932 = vmatmul.bf16.gmra.mxu1 %v2657_v62 }
 0x2b3   : > { %v2560_v12 = vpop.permute.xlu1 %2559 }
 0x2b4   : > { %v2688_v16 = vsel %vm1114_vm2, %v5283_v18, %v2560_v12 }
 0x2b5   : > { %v2705_v27 = vsel %vm1135_vm3, %v2688_v16, %v2577_v44 }
 0x2b7   : > { %v2603_v38 = vpop.permute.xlu0 %2602 }
 0x2b8   : > { %v2724_v61 = vsel %vm1156_vm4, %v2703_v29, %v2603_v38  ;;  %v2579_v18 = vpop.permute.xlu2 %2578 }
 0x2b9   : > { %2986 = vmatmul.bf16.gmra.mxu2 %v2724_v61 }
 0x2bb   : > { %v2455_v42 = vpop.permute.xlu1 %2454 }
 0x2bc   : > { %v2625_v52 = vsel %vm1114_vm2, %v5213_v4, %v2455_v42 }
 0x2bd   : > { %v2641_v32 = vsel %vm1135_vm3, %v2625_v52, %v2511_v28 }
 0x2bf   : > { %v2526_v59 = vpop.permute.xlu0 %2525 }
 0x2c0   : > { %v2660_v39 = vsel %vm1156_vm4, %v2639_v40, %v2526_v59  ;;  %v2513_v5 = vpop.permute.xlu2 %2512 }
 0x2c1   : > { %2937 = vmatmul.bf16.gmra.mxu1 %v2660_v39 }
 0x2c3   : > { %v2562_v43 = vpop.permute.xlu1 %2561 }
 0x2c4   : > { %v2691_v14 = vsel %vm1114_vm2, %v5313_v63, %v2562_v43  ;;  %v3016_v63 = vpop.f32.mrf.mxu3 }
 0x2c5   : > { %v2707_v25 = vsel %vm1135_vm3, %v2691_v14, %v2579_v18 }
 0x2c7   : > { %v2605_v54 = vpop.permute.xlu0 %2604 }
 0x2c8   : > { %v2727_v21 = vsel %vm1156_vm4, %v2705_v27, %v2605_v54 }
 0x2c9   : > { %2991 = vmatmul.bf16.gmra.mxu2 %v2727_v21 }
 0x2cb   : > { %v2457_v47 = vpop.permute.xlu1 %2456 }
 0x2cc   : > { %v2627_v4 = vsel %vm1114_vm2, %v5262_v55, %v2457_v47  ;;  %v3018_v22 = vpop.f32.mrf.mxu3 }
 0x2cd   : > { %v2643_v58 = vsel %vm1135_vm3, %v2627_v4, %v2513_v5 }
 0x2cf   : > { %v2528_v19 = vpop.permute.xlu0 %2527 }
 0x2d0   : > { %v2663_v13 = vsel %vm1156_vm4, %v2641_v32, %v2528_v19 }
 0x2d1   : > { %2942 = vmatmul.bf16.gmra.mxu1 %v2663_v13 }
 0x2d4   : > { %v3021_v60 = vpop.f32.mrf.mxu3 }
 0x2d7   : > { %v2607_v0 = vpop.permute.xlu0 %2606 }
 0x2d8   : > { %v2730_v34 = vsel %vm1156_vm4, %v2707_v25, %v2607_v0 }
 0x2d9   : > { %2996 = vmatmul.bf16.gmra.mxu2 %v2730_v34 }
 0x2dc   : > { %v3023_v51 = vpop.f32.mrf.mxu3 }
 0x2df   : > { %v2530_v15 = vpop.permute.xlu0 %2529 }
 0x2e0   : > { %v2666_v20 = vsel %vm1156_vm4, %v2643_v58, %v2530_v15 }
 0x2e1   : > { %2947 = vmatmul.bf16.gmra.mxu1 %v2666_v20 }
 0x2e4   : > { %v3026_v61 = vpop.f32.mrf.mxu3 }
 0x2ec   : > { %v2962_v3 = vpop.f32.mrf.mxu2  ;;  %v3028_v42 = vpop.f32.mrf.mxu3 }
 0x2ee   : > { %v2913_v8 = vpop.f32.mrf.mxu1 }
 0x2ef   : > { %v2914_v55 = vadd.f32 %v5403_v24, %v2913_v8 }
 0x2f1   : > { %v2963_v23 = vadd.f32 %v2962_v3, %v2914_v55 }
 0x2f3   : > { %v3012_v36 = vadd.f32 %v3011_v49, %v2963_v23 }
 0x2f4   : > { %v2964_v33 = vpop.f32.mrf.mxu2  ;;  %v3031_v13 = vpop.f32.mrf.mxu3 }
 0x2f5   : > { %v3051_v45 = vmax.f32 %v3012_v36, 0.0 }
 0x2f6   : > { %v2915_v30 = vpop.f32.mrf.mxu1 }
 0x2f7   : > { %v2916_v57 = vadd.f32 %v5403_v24, %v2915_v30 }
 0x2f9   : > { %v2965_v48 = vadd.f32 %v2964_v33, %v2916_v57 }
 0x2fb   : > { %v3014_v1 = vadd.f32 %v3013_v26, %v2965_v48 }
 0x2fc   : > { %v2967_v10 = vpop.f32.mrf.mxu2  ;;  %v3033_v5 = vpop.f32.mrf.mxu3 }
 0x2fd   : > { %v3052_v31 = vmax.f32 %v3014_v1, 0.0 }
 0x2fe   : > { %v2918_v7 = vpop.f32.mrf.mxu1 }
 0x2ff   : > { %v3629_v9 = vpack.c.bf16 %v3052_v31, %v3051_v45  ;;  %v2919_v17 = vadd.f32 %v5403_v24, %v2918_v7 }
 0x301   : > { %3630 = vst [vmem:[%s5412_s19] sm:$0xff] %v3629_v9   ;;  %v2968_v50 = vadd.f32 %v2967_v10, %v2919_v17 }
 0x303   : > { %v3017_v6 = vadd.f32 %v3016_v63, %v2968_v50 }
 0x304   : > { %v2969_v11 = vpop.f32.mrf.mxu2 }
 0x305   : > { %v3053_v37 = vmax.f32 %v3017_v6, 0.0 }
 0x306   : > { %v2920_v53 = vpop.f32.mrf.mxu1 }
 0x307   : > { %v2921_v41 = vadd.f32 %v5403_v24, %v2920_v53 }
 0x309   : > { %v2970_v46 = vadd.f32 %v2969_v11, %v2921_v41 }
 0x30b   : > { %v3019_v62 = vadd.f32 %v3018_v22, %v2970_v46  ;;  %v3036_v22 = vpop.f32.mrf.mxu3 }
 0x30c   : > { %v2972_v35 = vpop.f32.mrf.mxu2 }
 0x30d   : > { %v3054_v56 = vmax.f32 %v3019_v62, 0.0 }
 0x30e   : > { %v2923_v38 = vpop.f32.mrf.mxu1 }
 0x30f   : > { %v3634_v29 = vpack.c.bf16 %v3054_v56, %v3053_v37  ;;  %v2924_v12 = vadd.f32 %v5403_v24, %v2923_v38 }
 0x311   : > { %3666 = vst [vmem:[%s5412_s19 + $0x8] sm:$0xff] %v3634_v29   ;;  %v2973_v59 = vadd.f32 %v2972_v35, %v2924_v12 }
 0x313   : > { %v3022_v39 = vadd.f32 %v3021_v60, %v2973_v59  ;;  %v3038_v45 = vpop.f32.mrf.mxu3 }
 0x314   : > { %v2974_v2 = vpop.f32.mrf.mxu2 }
 0x315   : > { %v3055_v21 = vmax.f32 %v3022_v39, 0.0 }
 0x316   : > { %v2925_v40 = vpop.f32.mrf.mxu1 }
 0x317   : > { %v2926_v44 = vadd.f32 %v5403_v24, %v2925_v40 }
 0x319   : > { %v2975_v16 = vadd.f32 %v2974_v2, %v2926_v44 }
 0x31b   : > { %v3024_v54 = vadd.f32 %v3023_v51, %v2975_v16  ;;  %v3041_v51 = vpop.f32.mrf.mxu3 }
 0x31c   : > { %v2977_v27 = vpop.f32.mrf.mxu2 }
 0x31d   : > { %v3056_v28 = vmax.f32 %v3024_v54, 0.0 }
 0x31e   : > { %v2928_v52 = vpop.f32.mrf.mxu1 }
 0x31f   : > { %v3639_v43 = vpack.c.bf16 %v3056_v28, %v3055_v21  ;;  %v2929_v19 = vadd.f32 %v5403_v24, %v2928_v52 }
 0x321   : > { %3667 = vst [vmem:[%s5412_s19 + $0x10] sm:$0xff] %v3639_v43   ;;  %v2978_v49 = vadd.f32 %v2977_v27, %v2929_v19 }
 0x323   : > { %v3027_v0 = vadd.f32 %v3026_v61, %v2978_v49  ;;  %v3043_v29 = vpop.f32.mrf.mxu3 }
 0x324   : > { %v2979_v32 = vpop.f32.mrf.mxu2 }
 0x325   : > { %v3057_v47 = vmax.f32 %v3027_v0, 0.0 }
 0x326   : > { %v2930_v18 = vpop.f32.mrf.mxu1 }
 0x327   : > { %v2931_v14 = vadd.f32 %v5403_v24, %v2930_v18 }
 0x329   : > { %v2980_v25 = vadd.f32 %v2979_v32, %v2931_v14 }
 0x32b   : > { %v3029_v34 = vadd.f32 %v3028_v42, %v2980_v25  ;;  %v3046_v27 = vpop.f32.mrf.mxu3 }
 0x32c   : > { %v2982_v26 = vpop.f32.mrf.mxu2 }
 0x32d   : > { %v3058_v4 = vmax.f32 %v3029_v34, 0.0 }
 0x32e   : > { %v2933_v58 = vpop.f32.mrf.mxu1 }
 0x32f   : > { %v3644_v15 = vpack.c.bf16 %v3058_v4, %v3057_v47  ;;  %v2934_v20 = vadd.f32 %v5403_v24, %v2933_v58 }
 0x331   : > { %3668 = vst [vmem:[%s5412_s19 + $0x18] sm:$0xff] %v3644_v15   ;;  %v2983_v3 = vadd.f32 %v2982_v26, %v2934_v20 }
 0x333   : > { %v3032_v33 = vadd.f32 %v3031_v13, %v2983_v3  ;;  %v3048_v49 = vpop.f32.mrf.mxu3 }
 0x334   : > { %v2984_v63 = vpop.f32.mrf.mxu2 }
 0x335   : > { %v3059_v36 = vmax.f32 %v3032_v33, 0.0 }
 0x336   : > { %v2935_v8 = vpop.f32.mrf.mxu1 }
 0x337   : > { %v2936_v55 = vadd.f32 %v5403_v24, %v2935_v8 }
 0x339   : > { %v2985_v23 = vadd.f32 %v2984_v63, %v2936_v55 }
 0x33b   : > { %v3034_v30 = vadd.f32 %v3033_v5, %v2985_v23 }
 0x33c   : > { %v2987_v57 = vpop.f32.mrf.mxu2 }
 0x33d   : > { %v3060_v48 = vmax.f32 %v3034_v30, 0.0 }
 0x33e   : > { %v2938_v1 = vpop.f32.mrf.mxu1 }
 0x33f   : > { %v3649_v10 = vpack.c.bf16 %v3060_v48, %v3059_v36  ;;  %v2939_v60 = vadd.f32 %v5403_v24, %v2938_v1 }
 0x341   : > { %3669 = vst [vmem:[%s5412_s19 + $0x20] sm:$0xff] %v3649_v10   ;;  %v2988_v7 = vadd.f32 %v2987_v57, %v2939_v60 }
 0x343   : > { %v3037_v11 = vadd.f32 %v3036_v22, %v2988_v7 }
 0x344   : > { %v2989_v31 = vpop.f32.mrf.mxu2 }
 0x345   : > { %v3061_v6 = vmax.f32 %v3037_v11, 0.0 }
 0x346   : > { %v2940_v9 = vpop.f32.mrf.mxu1 }
 0x347   : > { %v2941_v17 = vadd.f32 %v5403_v24, %v2940_v9 }
 0x349   : > { %v2990_v50 = vadd.f32 %v2989_v31, %v2941_v17 }
 0x34b   : > { %v3039_v53 = vadd.f32 %v3038_v45, %v2990_v50 }
 0x34c   : > { %v2992_v41 = vpop.f32.mrf.mxu2 }
 0x34d   : > { %v3062_v46 = vmax.f32 %v3039_v53, 0.0 }
 0x34e   : > { %v2943_v62 = vpop.f32.mrf.mxu1 }
 0x34f   : > { %v3654_v35 = vpack.c.bf16 %v3062_v46, %v3061_v6  ;;  %v2944_v37 = vadd.f32 %v5403_v24, %v2943_v62 }
 0x351   : > { %3670 = vst [vmem:[%s5412_s19 + $0x28] sm:$0xff] %v3654_v35   ;;  %v2993_v38 = vadd.f32 %v2992_v41, %v2944_v37 }
 0x353   : > { %v3042_v2 = vadd.f32 %v3041_v51, %v2993_v38 }
 0x354   : > { %v2994_v56 = vpop.f32.mrf.mxu2 }
 0x355   : > { %v3063_v44 = vmax.f32 %v3042_v2, 0.0 }
 0x356   : > { %v2945_v61 = vpop.f32.mrf.mxu1 }
 0x357   : > { %v2946_v12 = vadd.f32 %v5403_v24, %v2945_v61 }
 0x359   : > { %v2995_v59 = vadd.f32 %v2994_v56, %v2946_v12 }
 0x35b   : > { %v3044_v40 = vadd.f32 %v3043_v29, %v2995_v59 }
 0x35c   : > { %v2997_v16 = vpop.f32.mrf.mxu2 }
 0x35d   : > { %v3064_v39 = vmax.f32 %v3044_v40, 0.0 }
 0x35e   : > { %v2948_v42 = vpop.f32.mrf.mxu1 }
 0x35f   : > { %v3659_v54 = vpack.c.bf16 %v3064_v39, %v3063_v44  ;;  %v2949_v21 = vadd.f32 %v5403_v24, %v2948_v42 }
 0x361   : > { %3671 = vst [vmem:[%s5412_s19 + $0x30] sm:$0xff] %v3659_v54   ;;  %v2998_v28 = vadd.f32 %v2997_v16, %v2949_v21 }
 0x363   : > { %v3047_v32 = vadd.f32 %v3046_v27, %v2998_v28 }
 0x364   : > { %v2999_v19 = vpop.f32.mrf.mxu2 }
 0x365   : > { %v3065_v14 = vmax.f32 %v3047_v32, 0.0 }
 0x366   : > { %v2950_v52 = vpop.f32.mrf.mxu1 }
 0x367   : > { %v2951_v43 = vadd.f32 %v5403_v24, %v2950_v52 }
 0x369   : > { %v3000_v13 = vadd.f32 %v2999_v19, %v2951_v43 }
 0x36b   : > { %v3049_v18 = vadd.f32 %v3048_v49, %v3000_v13 }
 0x36d   : > { %v3066_v0 = vmax.f32 %v3049_v18, 0.0 }
 0x36f   : > { %v3664_v25 = vpack.c.bf16 %v3066_v0, %v3065_v14 }
 0x371   : > { %3672 = vst [vmem:[%s5412_s19 + $0x38] sm:$0xff] %v3664_v25  }
 0x372 PF: > { %s16_s25 = sadd.s32 1, %s3758_s25   ;;  %s5492_s21 = smov %s3750_s23 }
 0x373   : > { %p13_p7 = scmp.ge.s32.totalorder %s16_s25, 6   ;;  %s5493_s22 = smov %s3754_s24 }
 0x374   : > { %s5494_s23 = smov %s5497_s26  ;;  %s5495_s24 = smov %s5501_s27 }
 0x375   :  { %15 = sbr.rel (!%p13_p7) target bundleno = 3 (0x3), region = 79 }

</bundles_post_ra>
